<compile_context>
chip_gen: v5e
topology: v5e:2x2
jax: 0.10.0
libtpu: 0.0.40
codegen_flags: <defaults>
</compile_context>

<pallas_src>
import functools
import math

import jax
import jax.numpy as jnp
import numpy as np
from jax.experimental import pallas as pl
from jax.experimental.pallas import tpu as pltpu
from jax.scipy.special import erf  # used only in the pure-JAX reference

# ----------------------------- configuration --------------------------------
SENT_DIM = 64        # TextEncoder.sent_dim
FC_DIM = 32          # fc_dim
MP_FEA_SIZE = 20     # mp_fea_size[-1] (GNN_Meta_Path branch)
MP_FEA_HID = 32      # args.metapath_fea_hid   (args.mp_fc_layer = 1)
N_MP = 8             # metapaths per (question, choice) sample
WEIGHT_GSC = 0.5     # args.weight_gsc         (args.learn_weight_gsc = False)
LN_EPS = 1e-5        # nn.LayerNorm default eps

# graph-side inputs that SAFE accepts but this configuration ignores
N_NODE = 8
N_CONCEPT = 20


# ------------------------------ math helpers ---------------------------------
def _erf_poly(x):
    # Abramowitz & Stegun 7.1.26 rational approximation, |err| <= 1.5e-7.
    ax = jnp.abs(x)
    t = 1.0 / (1.0 + 0.3275911 * ax)
    poly = t * (0.254829592 + t * (-0.284496736 + t * (1.421413741
               + t * (-1.453152027 + t * 1.061405429))))
    y = 1.0 - poly * jnp.exp(-ax * ax)
    return jnp.where(x < 0.0, -y, y)


def _gelu(x):
    # QAGNN GELU: x * 0.5 * (1 + erf(x / sqrt(2)))
    return x * 0.5 * (1.0 + _erf_poly(x * 0.7071067811865476))


def _layernorm(x, gamma, beta):
    mu = jnp.mean(x, axis=-1, keepdims=True)
    var = jnp.mean(jnp.square(x - mu), axis=-1, keepdims=True)
    return (x - mu) * jax.lax.rsqrt(var + LN_EPS) * gamma + beta


# ------------------------------ fused kernel ---------------------------------
def _safe_decoder_kernel(mpf_ref, cnt_ref, sent_ref, pmp_ref, pfc_ref, scal_ref,
                         out_ref, *, n_mp):
    """Whole SAFE decoder forward for one tile of samples.

    mpf_ref  : (n_mp, tileB, F)  metapath features, metapath-major
    cnt_ref  : (n_mp, tileB, 1)  metapath counts (sublane-dense columns)
    sent_ref : (tileB, S)        sentence vectors (TextEncoder output)
    pmp_ref  : (F+4, HID)        rows = [W1 ; b1 ; ln_g ; ln_b ; W2^T]  (mp MLP)
    pfc_ref  : (S+4, FC)         rows = [W1 ; b1 ; ln_g ; ln_b ; W2^T]  (fc MLP)
    scal_ref : (4,) in SMEM      [weight_gsc, mp_b2, fc_b2, 0]
    out_ref  : (tileB, 3)        columns = [logits | context_score | graph_score]
    """
    F = pmp_ref.shape[0] - 4
    S = pfc_ref.shape[0] - 4

    w_gsc = scal_ref[0]
    mp_b2 = scal_ref[1]
    fc_b2 = scal_ref[2]

    # metapath-MLP parameters (loaded once, reused across the unrolled loop)
    w1 = pmp_ref[0:F, :]
    b1 = pmp_ref[F:F + 1, :]
    g1 = pmp_ref[F + 1:F + 2, :]
    be1 = pmp_ref[F + 2:F + 3, :]
    w2 = pmp_ref[F + 3:F + 4, :]

    # --- per-metapath MLP score, count-weighted, accumulated over n_mp -------
    # (project-then-segment-reduce: O(B) work, no B x (B*n_mp) mask, no reshapes)
    z = None
    for m in range(n_mp):                                     # n_mp is static
        h = jnp.dot(mpf_ref[m], w1,
                    preferred_element_type=jnp.float32) + b1  # (tileB, HID)
        h = _gelu(_layernorm(h, g1, be1))
        s = jnp.sum(h * w2, axis=1, keepdims=True) + mp_b2    # (tileB, 1)
        contrib = s * cnt_ref[m]                              # count weighting
        z = contrib if z is None else z + contrib
    graph_score = z * w_gsc                                   # (tileB, 1)

    # --- fc head on sent_vecs: Linear -> LayerNorm -> GELU -> Linear(1) ------
    wf1 = pfc_ref[0:S, :]
    bf1 = pfc_ref[S:S + 1, :]
    gf = pfc_ref[S + 1:S + 2, :]
    bef = pfc_ref[S + 2:S + 3, :]
    wf2 = pfc_ref[S + 3:S + 4, :]

    hf = jnp.dot(sent_ref[...], wf1,
                 preferred_element_type=jnp.float32) + bf1    # (tileB, FC)
    hf = _gelu(_layernorm(hf, gf, bef))
    context_score = jnp.sum(hf * wf2, axis=1, keepdims=True) + fc_b2

    # --- pack [logits | context | graph] into the (tileB, 3) output block ----
    # TODO(synk): for very large B a lane-dense (3, B) output avoids masked
    # partial stores; at the shapes here the packed (B, 3) block is fine.
    out_ref[:, 0:1] = context_score + graph_score
    out_ref[:, 1:2] = context_score
    out_ref[:, 2:3] = graph_score


def _pick_tile_b(B):
    """Tile over samples: full batch when small, 8-aligned divisor when large."""
    if B <= 256:
        return B
    for t in (512, 256, 128, 64, 32, 16, 8):
        if B % t == 0:
            return t
    return B


def safe_decoder(packed, sent, mpf_mm, cnt_mm, n_mp):
    """One pallas_call for the entire Meta_Path_GNN decoder forward."""
    B, S = sent.shape
    F = mpf_mm.shape[-1]
    tile_b = _pick_tile_b(B)
    n_tiles = B // tile_b

    return pl.pallas_call(
        functools.partial(_safe_decoder_kernel, n_mp=n_mp),
        grid=(n_tiles,),
        in_specs=[
            pl.BlockSpec((n_mp, tile_b, F), lambda i: (0, i, 0)),
            pl.BlockSpec((n_mp, tile_b, 1), lambda i: (0, i, 0)),
            pl.BlockSpec((tile_b, S), lambda i: (i, 0)),
            pl.BlockSpec(packed["pmp"].shape, lambda i: (0, 0)),
            pl.BlockSpec(packed["pfc"].shape, lambda i: (0, 0)),
            pl.BlockSpec(memory_space=pltpu.MemorySpace.SMEM),   # 3 scalars
        ],
        out_specs=pl.BlockSpec((tile_b, 3), lambda i: (i, 0)),
        out_shape=jax.ShapeDtypeStruct((B, 3), jnp.float32),
        compiler_params=pltpu.CompilerParams(
            dimension_semantics=("parallel",)),  # shards tiles across TCs (v7x)
    )(mpf_mm, cnt_mm, sent, packed["pmp"], packed["pfc"], packed["scal"])


# ------------------------------ model wrapper ---------------------------------
def safe_forward(packed, sent_vecs, concept_ids, node_type_ids, node_scores,
                 adj_lengths, metapath_feature, metapath_feature_count):
    """SAFE.forward (decoder side), eval mode.

    sent_vecs:               (bs, nc, sent_dim)   -- TextEncoder output
    metapath_feature:        (bs, nc, n_mp, mp_fea_size)
    metapath_feature_count:  (bs, nc, n_mp)
    concept_ids / node_type_ids / node_scores / adj_lengths belong to SAFE's
    interface but are unused in this configuration (GNN_Meta_Path only touches
    the metapath features; the decoder receives adj=None).
    Returns: logits (bs, nc), (context_score (bs, nc), graph_score (bs, nc))
    """
    del concept_ids, node_type_ids, node_scores, adj_lengths  # unused here
    bs, nc = sent_vecs.shape[0], sent_vecs.shape[1]
    B = bs * nc
    n_mp, F = metapath_feature.shape[2], metapath_feature.shape[3]

    sent = sent_vecs.reshape(B, sent_vecs.shape[-1])
    # metapath-major layouts: row [m, b] holds metapath m of flattened sample b
    mpf_mm = jnp.transpose(metapath_feature.reshape(B, n_mp, F), (1, 0, 2))
    cnt_mm = jnp.transpose(metapath_feature_count.reshape(B, n_mp),
                           (1, 0))[:, :, None]

    out = safe_decoder(packed, sent, mpf_mm, cnt_mm, n_mp)
    logits = out[:, 0].reshape(bs, nc)
    context_score = out[:, 1].reshape(bs, nc)
    graph_score = out[:, 2].reshape(bs, nc)
    return logits, (context_score, graph_score)


# ------------------------------ parameters ------------------------------------
def init_params(key):
    # Linear weights ~ N(0, 0.02) per _init_weights.  Biases / LayerNorm params
    # get small random perturbations so every term of the fused kernel is
    # exercised by the numerical check below.
    ks = jax.random.split(key, 12)

    def nrm(k, shape, scale=0.02):
        return scale * jax.random.normal(k, shape, jnp.float32)

    return {
        # metapath_fea_encoder = MLP(mp_fea_size, mp_hid, 1, 1, layer_norm=True)
        "mp_w1": nrm(ks[0], (MP_FEA_SIZE, MP_FEA_HID)),
        "mp_b1": nrm(ks[1], (MP_FEA_HID,)),
        "mp_ln_g": 1.0 + nrm(ks[2], (MP_FEA_HID,)),
        "mp_ln_b": nrm(ks[3], (MP_FEA_HID,)),
        "mp_w2": nrm(ks[4], (MP_FEA_HID, 1)),
        "mp_b2": nrm(ks[5], ()),
        # fc = MLP(sent_dim, fc_dim, 1, 1, layer_norm=True)
        "fc_w1": nrm(ks[6], (SENT_DIM, FC_DIM)),
        "fc_b1": nrm(ks[7], (FC_DIM,)),
        "fc_ln_g": 1.0 + nrm(ks[8], (FC_DIM,)),
        "fc_ln_b": nrm(ks[9], (FC_DIM,)),
        "fc_w2": nrm(ks[10], (FC_DIM, 1)),
        "fc_b2": nrm(ks[11], ()),
    }


def pack_params(p):
    """Pack the 12 small tensors into 2 parameter slabs + 1 SMEM scalar vector."""
    pmp = jnp.concatenate([
        p["mp_w1"],                       # (F, HID)
        p["mp_b1"][None, :],
        p["mp_ln_g"][None, :],
        p["mp_ln_b"][None, :],
        p["mp_w2"].T,                     # (1, HID)
    ], axis=0)                            # (F+4, HID)
    pfc = jnp.concatenate([
        p["fc_w1"],                       # (S, FC)
        p["fc_b1"][None, :],
        p["fc_ln_g"][None, :],
        p["fc_ln_b"][None, :],
        p["fc_w2"].T,                     # (1, FC)
    ], axis=0)                            # (S+4, FC)
    scal = jnp.stack([jnp.float32(WEIGHT_GSC), p["mp_b2"], p["fc_b2"],
                      jnp.float32(0.0)]).astype(jnp.float32)   # (4,)
    return {"pmp": pmp, "pfc": pfc, "scal": scal}


# --------------------------- pure-JAX reference --------------------------------
def reference_forward(p, sent_vecs, metapath_feature, metapath_feature_count):
    """Direct transcription of the PyTorch forward (exact erf GELU)."""
    def gelu_exact(x):
        return x * 0.5 * (1.0 + erf(x / math.sqrt(2.0)))

    bs, nc = sent_vecs.shape[:2]
    B = bs * nc
    n_mp = metapath_feature.shape[2]
    mpf = metapath_feature.reshape(B, n_mp, -1)
    cnt = metapath_feature_count.reshape(B, n_mp, 1)

    h = gelu_exact(_layernorm(mpf @ p["mp_w1"] + p["mp_b1"],
                              p["mp_ln_g"], p["mp_ln_b"]))
    mp_score = h @ p["mp_w2"] + p["mp_b2"]            # (B, n_mp, 1)
    aggr_out = jnp.sum(mp_score * cnt, axis=1)        # (B, 1)  == Z_vecs
    graph_score = aggr_out * WEIGHT_GSC

    sent = sent_vecs.reshape(B, -1)
    hf = gelu_exact(_layernorm(sent @ p["fc_w1"] + p["fc_b1"],
                               p["fc_ln_g"], p["fc_ln_b"]))
    context_score = hf @ p["fc_w2"] + p["fc_b2"]      # (B, 1)
    logits = context_score + graph_score
    return (logits.reshape(bs, nc),
            (context_score.reshape(bs, nc), graph_score.reshape(bs, nc)))


# ----------------------------------- main ---------------------------------------
if __name__ == "__main__":
    key = jax.random.PRNGKey(0)
    kp, kd = jax.random.split(key)
    params = init_params(kp)
    packed = pack_params(params)

    bs, nc = 2, 2                                   # (batch, num_choice)
    ks = jax.random.split(kd, 6)
    sent_vecs = jax.random.normal(ks[0], (bs, nc, SENT_DIM), jnp.float32)
    metapath_feature = jax.random.normal(ks[1], (bs, nc, N_MP, MP_FEA_SIZE),
                                         jnp.float32)
    metapath_feature_count = jax.random.uniform(ks[2], (bs, nc, N_MP),
                                                jnp.float32, minval=0.0,
                                                maxval=3.0)
    # graph-side inputs: part of SAFE's interface, unused by this configuration
    concept_ids = jax.random.randint(ks[3], (bs, nc, N_NODE), 0, N_CONCEPT,
                                     dtype=jnp.int32)
    node_type_ids = jax.random.randint(ks[4], (bs, nc, N_NODE), 0, 4,
                                       dtype=jnp.int32)
    node_scores = jax.random.normal(ks[5], (bs, nc, N_NODE, 1), jnp.float32)
    adj_lengths = jnp.full((bs, nc), N_NODE, jnp.int32)

    fwd = jax.jit(safe_forward)
    logits, scores = fwd(packed, sent_vecs, concept_ids, node_type_ids,
                         node_scores, adj_lengths, metapath_feature,
                         metapath_feature_count)
    jax.block_until_ready((logits, scores))

    assert logits.shape == (bs, nc)
    assert scores[0].shape == (bs, nc) and scores[1].shape == (bs, nc)

    # numerical cross-check against the straight PyTorch-order reference
    ref_logits, ref_scores = reference_forward(params, sent_vecs,
                                               metapath_feature,
                                               metapath_feature_count)
    np.testing.assert_allclose(np.asarray(logits), np.asarray(ref_logits),
                               rtol=5e-3, atol=5e-4)
    np.testing.assert_allclose(np.asarray(scores[0]), np.asarray(ref_scores[0]),
                               rtol=5e-3, atol=5e-4)
    np.testing.assert_allclose(np.asarray(scores[1]), np.asarray(ref_scores[1]),
                               rtol=5e-3, atol=5e-4)

    print("KERNEL_OK")
</pallas_src>

<mosaic_0001>
module attributes {stable_mosaic.version = 11 : i64} {
  func.func @_safe_decoder_kernel(%arg0: i32, %arg1: memref<8x4x20xf32, #tpu.memory_space<vmem>>, %arg2: memref<8x4x1xf32, #tpu.memory_space<vmem>>, %arg3: memref<4x64xf32, #tpu.memory_space<vmem>>, %arg4: memref<24x32xf32, #tpu.memory_space<vmem>>, %arg5: memref<68x32xf32, #tpu.memory_space<vmem>>, %arg6: memref<4xf32, #tpu.memory_space<smem>>, %arg7: memref<4x3xf32, #tpu.memory_space<vmem>>) attributes {dimension_semantics = [#tpu.dimension_semantics<parallel>], iteration_bounds = array<i64: 1>, scalar_prefetch = 0 : i64, scratch_operands = 0 : i64, tpu.core_type = #tpu.core_type<tc>, window_params = [{transform_indices = @transform_0, window_bounds = array<i64: 8, 4, 20>}, {transform_indices = @transform_1, window_bounds = array<i64: 8, 4, 1>}, {transform_indices = @transform_2, window_bounds = array<i64: 4, 64>}, {pipeline_mode = #tpu.pipeline_mode<synchronous>, transform_indices = @transform_3, window_bounds = array<i64: 24, 32>}, {pipeline_mode = #tpu.pipeline_mode<synchronous>, transform_indices = @transform_4, window_bounds = array<i64: 68, 32>}, {transform_indices = @transform_5, window_bounds = array<i64: 4>}, {transform_indices = @transform_6, window_bounds = array<i64: 4, 3>}]} {
    %c0 = arith.constant 0 : index
    %0 = memref.load %arg6[%c0] : memref<4xf32, #tpu.memory_space<smem>>
    %c1 = arith.constant 1 : index
    %1 = memref.load %arg6[%c1] : memref<4xf32, #tpu.memory_space<smem>>
    %c2 = arith.constant 2 : index
    %2 = memref.load %arg6[%c2] : memref<4xf32, #tpu.memory_space<smem>>
    %c0_0 = arith.constant 0 : index
    %c0_1 = arith.constant 0 : index
    %3 = vector.load %arg4[%c0_0, %c0_1] : memref<24x32xf32, #tpu.memory_space<vmem>>, vector<20x32xf32>
    %c20 = arith.constant 20 : index
    %c0_2 = arith.constant 0 : index
    %4 = vector.load %arg4[%c20, %c0_2] : memref<24x32xf32, #tpu.memory_space<vmem>>, vector<1x32xf32>
    %c21 = arith.constant 21 : index
    %c0_3 = arith.constant 0 : index
    %5 = vector.load %arg4[%c21, %c0_3] : memref<24x32xf32, #tpu.memory_space<vmem>>, vector<1x32xf32>
    %c22 = arith.constant 22 : index
    %c0_4 = arith.constant 0 : index
    %6 = vector.load %arg4[%c22, %c0_4] : memref<24x32xf32, #tpu.memory_space<vmem>>, vector<1x32xf32>
    %c23 = arith.constant 23 : index
    %c0_5 = arith.constant 0 : index
    %7 = vector.load %arg4[%c23, %c0_5] : memref<24x32xf32, #tpu.memory_space<vmem>>, vector<1x32xf32>
    %c0_6 = arith.constant 0 : index
    %c0_7 = arith.constant 0 : index
    %c0_8 = arith.constant 0 : index
    %8 = vector.load %arg1[%c0_6, %c0_7, %c0_8] : memref<8x4x20xf32, #tpu.memory_space<vmem>>, vector<1x4x20xf32>
    %9 = vector.shape_cast %8 : vector<1x4x20xf32> to vector<4x20xf32>
    %cst = arith.constant dense<0.000000e+00> : vector<4x32xf32>
    %10 = tpu.matmul %9, %3, %cst {dimension_numbers = #tpu.dot_dimension_numbers<[1], [0], [0], [1], [0, 0, 1, 1], [], []>} : vector<4x20xf32>, vector<20x32xf32>, vector<4x32xf32> -> vector<4x32xf32>
    %11 = vector.broadcast %4 : vector<1x32xf32> to vector<4x32xf32>
    %12 = arith.addf %10, %11 : vector<4x32xf32>
    %cst_9 = arith.constant dense<0.000000e+00> : vector<4xf32>
    %13 = vector.multi_reduction <add>, %12, %cst_9 [1] : vector<4x32xf32> to vector<4xf32>
    %14 = vector.shape_cast %13 : vector<4xf32> to vector<4x1xf32>
    %cst_10 = arith.constant 3.200000e+01 : f32
    %15 = vector.broadcast %cst_10 : f32 to vector<4x1xf32>
    %16 = arith.divf %14, %15 : vector<4x1xf32>
    %17 = vector.broadcast %16 : vector<4x1xf32> to vector<4x32xf32>
    %18 = arith.subf %12, %17 : vector<4x32xf32>
    %19 = arith.mulf %18, %18 : vector<4x32xf32>
    %cst_11 = arith.constant dense<0.000000e+00> : vector<4xf32>
    %20 = vector.multi_reduction <add>, %19, %cst_11 [1] : vector<4x32xf32> to vector<4xf32>
    %21 = vector.shape_cast %20 : vector<4xf32> to vector<4x1xf32>
    %cst_12 = arith.constant 3.200000e+01 : f32
    %22 = vector.broadcast %cst_12 : f32 to vector<4x1xf32>
    %23 = arith.divf %21, %22 : vector<4x1xf32>
    %24 = vector.broadcast %16 : vector<4x1xf32> to vector<4x32xf32>
    %25 = arith.subf %12, %24 : vector<4x32xf32>
    %cst_13 = arith.constant 9.99999974E-6 : f32
    %26 = vector.broadcast %cst_13 : f32 to vector<4x1xf32>
    %27 = arith.addf %23, %26 : vector<4x1xf32>
    %28 = math.rsqrt %27 : vector<4x1xf32>
    %29 = vector.broadcast %28 : vector<4x1xf32> to vector<4x32xf32>
    %30 = arith.mulf %25, %29 : vector<4x32xf32>
    %31 = vector.broadcast %5 : vector<1x32xf32> to vector<4x32xf32>
    %32 = arith.mulf %30, %31 : vector<4x32xf32>
    %33 = vector.broadcast %6 : vector<1x32xf32> to vector<4x32xf32>
    %34 = arith.addf %32, %33 : vector<4x32xf32>
    %cst_14 = arith.constant 5.000000e-01 : f32
    %35 = vector.broadcast %cst_14 : f32 to vector<4x32xf32>
    %36 = arith.mulf %34, %35 : vector<4x32xf32>
    %cst_15 = arith.constant 0.707106769 : f32
    %37 = vector.broadcast %cst_15 : f32 to vector<4x32xf32>
    %38 = arith.mulf %34, %37 : vector<4x32xf32>
    %39 = math.absf %38 : vector<4x32xf32>
    %cst_16 = arith.constant 0.327591091 : f32
    %40 = vector.broadcast %cst_16 : f32 to vector<4x32xf32>
    %41 = arith.mulf %40, %39 : vector<4x32xf32>
    %cst_17 = arith.constant 1.000000e+00 : f32
    %42 = vector.broadcast %cst_17 : f32 to vector<4x32xf32>
    %43 = arith.addf %42, %41 : vector<4x32xf32>
    %cst_18 = arith.constant 1.000000e+00 : f32
    %44 = vector.broadcast %cst_18 : f32 to vector<4x32xf32>
    %45 = arith.divf %44, %43 : vector<4x32xf32>
    %cst_19 = arith.constant 1.06140542 : f32
    %46 = vector.broadcast %cst_19 : f32 to vector<4x32xf32>
    %47 = arith.mulf %45, %46 : vector<4x32xf32>
    %cst_20 = arith.constant -1.45315206 : f32
    %48 = vector.broadcast %cst_20 : f32 to vector<4x32xf32>
    %49 = arith.addf %48, %47 : vector<4x32xf32>
    %50 = arith.mulf %45, %49 : vector<4x32xf32>
    %cst_21 = arith.constant 1.42141378 : f32
    %51 = vector.broadcast %cst_21 : f32 to vector<4x32xf32>
    %52 = arith.addf %51, %50 : vector<4x32xf32>
    %53 = arith.mulf %45, %52 : vector<4x32xf32>
    %cst_22 = arith.constant -0.284496725 : f32
    %54 = vector.broadcast %cst_22 : f32 to vector<4x32xf32>
    %55 = arith.addf %54, %53 : vector<4x32xf32>
    %56 = arith.mulf %45, %55 : vector<4x32xf32>
    %cst_23 = arith.constant 0.254829586 : f32
    %57 = vector.broadcast %cst_23 : f32 to vector<4x32xf32>
    %58 = arith.addf %57, %56 : vector<4x32xf32>
    %59 = arith.mulf %45, %58 : vector<4x32xf32>
    %cst_24 = arith.constant 0.000000e+00 : f32
    %60 = vector.broadcast %cst_24 : f32 to vector<4x32xf32>
    %61 = arith.subf %60, %39 : vector<4x32xf32>
    %62 = arith.mulf %61, %39 : vector<4x32xf32>
    %63 = math.exp %62 : vector<4x32xf32>
    %64 = arith.mulf %59, %63 : vector<4x32xf32>
    %cst_25 = arith.constant 1.000000e+00 : f32
    %65 = vector.broadcast %cst_25 : f32 to vector<4x32xf32>
    %66 = arith.subf %65, %64 : vector<4x32xf32>
    %cst_26 = arith.constant 0.000000e+00 : f32
    %67 = vector.broadcast %cst_26 : f32 to vector<4x32xf32>
    %68 = arith.cmpf olt, %38, %67 : vector<4x32xf32>
    %cst_27 = arith.constant 0.000000e+00 : f32
    %69 = vector.broadcast %cst_27 : f32 to vector<4x32xf32>
    %70 = arith.subf %69, %66 : vector<4x32xf32>
    %71 = arith.select %68, %70, %66 : vector<4x32xi1>, vector<4x32xf32>
    %cst_28 = arith.constant 1.000000e+00 : f32
    %72 = vector.broadcast %cst_28 : f32 to vector<4x32xf32>
    %73 = arith.addf %72, %71 : vector<4x32xf32>
    %74 = arith.mulf %36, %73 : vector<4x32xf32>
    %75 = vector.broadcast %7 : vector<1x32xf32> to vector<4x32xf32>
    %76 = arith.mulf %74, %75 : vector<4x32xf32>
    %cst_29 = arith.constant dense<0.000000e+00> : vector<4xf32>
    %77 = vector.multi_reduction <add>, %76, %cst_29 [1] : vector<4x32xf32> to vector<4xf32>
    %78 = vector.shape_cast %77 : vector<4xf32> to vector<4x1xf32>
    %79 = vector.broadcast %1 : f32 to vector<4x1xf32>
    %80 = arith.addf %78, %79 : vector<4x1xf32>
    %c0_30 = arith.constant 0 : index
    %c0_31 = arith.constant 0 : index
    %c0_32 = arith.constant 0 : index
    %81 = vector.load %arg2[%c0_30, %c0_31, %c0_32] : memref<8x4x1xf32, #tpu.memory_space<vmem>>, vector<1x4x1xf32>
    %82 = vector.shape_cast %81 : vector<1x4x1xf32> to vector<4x1xf32>
    %83 = arith.mulf %80, %82 : vector<4x1xf32>
    %c1_33 = arith.constant 1 : index
    %c0_34 = arith.constant 0 : index
    %c0_35 = arith.constant 0 : index
    %84 = vector.load %arg1[%c1_33, %c0_34, %c0_35] : memref<8x4x20xf32, #tpu.memory_space<vmem>>, vector<1x4x20xf32>
    %85 = vector.shape_cast %84 : vector<1x4x20xf32> to vector<4x20xf32>
    %cst_36 = arith.constant dense<0.000000e+00> : vector<4x32xf32>
    %86 = tpu.matmul %85, %3, %cst_36 {dimension_numbers = #tpu.dot_dimension_numbers<[1], [0], [0], [1], [0, 0, 1, 1], [], []>} : vector<4x20xf32>, vector<20x32xf32>, vector<4x32xf32> -> vector<4x32xf32>
    %87 = vector.broadcast %4 : vector<1x32xf32> to vector<4x32xf32>
    %88 = arith.addf %86, %87 : vector<4x32xf32>
    %cst_37 = arith.constant dense<0.000000e+00> : vector<4xf32>
    %89 = vector.multi_reduction <add>, %88, %cst_37 [1] : vector<4x32xf32> to vector<4xf32>
    %90 = vector.shape_cast %89 : vector<4xf32> to vector<4x1xf32>
    %cst_38 = arith.constant 3.200000e+01 : f32
    %91 = vector.broadcast %cst_38 : f32 to vector<4x1xf32>
    %92 = arith.divf %90, %91 : vector<4x1xf32>
    %93 = vector.broadcast %92 : vector<4x1xf32> to vector<4x32xf32>
    %94 = arith.subf %88, %93 : vector<4x32xf32>
    %95 = arith.mulf %94, %94 : vector<4x32xf32>
    %cst_39 = arith.constant dense<0.000000e+00> : vector<4xf32>
    %96 = vector.multi_reduction <add>, %95, %cst_39 [1] : vector<4x32xf32> to vector<4xf32>
    %97 = vector.shape_cast %96 : vector<4xf32> to vector<4x1xf32>
    %cst_40 = arith.constant 3.200000e+01 : f32
    %98 = vector.broadcast %cst_40 : f32 to vector<4x1xf32>
    %99 = arith.divf %97, %98 : vector<4x1xf32>
    %100 = vector.broadcast %92 : vector<4x1xf32> to vector<4x32xf32>
    %101 = arith.subf %88, %100 : vector<4x32xf32>
    %cst_41 = arith.constant 9.99999974E-6 : f32
    %102 = vector.broadcast %cst_41 : f32 to vector<4x1xf32>
    %103 = arith.addf %99, %102 : vector<4x1xf32>
    %104 = math.rsqrt %103 : vector<4x1xf32>
    %105 = vector.broadcast %104 : vector<4x1xf32> to vector<4x32xf32>
    %106 = arith.mulf %101, %105 : vector<4x32xf32>
    %107 = vector.broadcast %5 : vector<1x32xf32> to vector<4x32xf32>
    %108 = arith.mulf %106, %107 : vector<4x32xf32>
    %109 = vector.broadcast %6 : vector<1x32xf32> to vector<4x32xf32>
    %110 = arith.addf %108, %109 : vector<4x32xf32>
    %cst_42 = arith.constant 5.000000e-01 : f32
    %111 = vector.broadcast %cst_42 : f32 to vector<4x32xf32>
    %112 = arith.mulf %110, %111 : vector<4x32xf32>
    %cst_43 = arith.constant 0.707106769 : f32
    %113 = vector.broadcast %cst_43 : f32 to vector<4x32xf32>
    %114 = arith.mulf %110, %113 : vector<4x32xf32>
    %115 = math.absf %114 : vector<4x32xf32>
    %cst_44 = arith.constant 0.327591091 : f32
    %116 = vector.broadcast %cst_44 : f32 to vector<4x32xf32>
    %117 = arith.mulf %116, %115 : vector<4x32xf32>
    %cst_45 = arith.constant 1.000000e+00 : f32
    %118 = vector.broadcast %cst_45 : f32 to vector<4x32xf32>
    %119 = arith.addf %118, %117 : vector<4x32xf32>
    %cst_46 = arith.constant 1.000000e+00 : f32
    %120 = vector.broadcast %cst_46 : f32 to vector<4x32xf32>
    %121 = arith.divf %120, %119 : vector<4x32xf32>
    %cst_47 = arith.constant 1.06140542 : f32
    %122 = vector.broadcast %cst_47 : f32 to vector<4x32xf32>
    %123 = arith.mulf %121, %122 : vector<4x32xf32>
    %cst_48 = arith.constant -1.45315206 : f32
    %124 = vector.broadcast %cst_48 : f32 to vector<4x32xf32>
    %125 = arith.addf %124, %123 : vector<4x32xf32>
    %126 = arith.mulf %121, %125 : vector<4x32xf32>
    %cst_49 = arith.constant 1.42141378 : f32
    %127 = vector.broadcast %cst_49 : f32 to vector<4x32xf32>
    %128 = arith.addf %127, %126 : vector<4x32xf32>
    %129 = arith.mulf %121, %128 : vector<4x32xf32>
    %cst_50 = arith.constant -0.284496725 : f32
    %130 = vector.broadcast %cst_50 : f32 to vector<4x32xf32>
    %131 = arith.addf %130, %129 : vector<4x32xf32>
    %132 = arith.mulf %121, %131 : vector<4x32xf32>
    %cst_51 = arith.constant 0.254829586 : f32
    %133 = vector.broadcast %cst_51 : f32 to vector<4x32xf32>
    %134 = arith.addf %133, %132 : vector<4x32xf32>
    %135 = arith.mulf %121, %134 : vector<4x32xf32>
    %cst_52 = arith.constant 0.000000e+00 : f32
    %136 = vector.broadcast %cst_52 : f32 to vector<4x32xf32>
    %137 = arith.subf %136, %115 : vector<4x32xf32>
    %138 = arith.mulf %137, %115 : vector<4x32xf32>
    %139 = math.exp %138 : vector<4x32xf32>
    %140 = arith.mulf %135, %139 : vector<4x32xf32>
    %cst_53 = arith.constant 1.000000e+00 : f32
    %141 = vector.broadcast %cst_53 : f32 to vector<4x32xf32>
    %142 = arith.subf %141, %140 : vector<4x32xf32>
    %cst_54 = arith.constant 0.000000e+00 : f32
    %143 = vector.broadcast %cst_54 : f32 to vector<4x32xf32>
    %144 = arith.cmpf olt, %114, %143 : vector<4x32xf32>
    %cst_55 = arith.constant 0.000000e+00 : f32
    %145 = vector.broadcast %cst_55 : f32 to vector<4x32xf32>
    %146 = arith.subf %145, %142 : vector<4x32xf32>
    %147 = arith.select %144, %146, %142 : vector<4x32xi1>, vector<4x32xf32>
    %cst_56 = arith.constant 1.000000e+00 : f32
    %148 = vector.broadcast %cst_56 : f32 to vector<4x32xf32>
    %149 = arith.addf %148, %147 : vector<4x32xf32>
    %150 = arith.mulf %112, %149 : vector<4x32xf32>
    %151 = vector.broadcast %7 : vector<1x32xf32> to vector<4x32xf32>
    %152 = arith.mulf %150, %151 : vector<4x32xf32>
    %cst_57 = arith.constant dense<0.000000e+00> : vector<4xf32>
    %153 = vector.multi_reduction <add>, %152, %cst_57 [1] : vector<4x32xf32> to vector<4xf32>
    %154 = vector.shape_cast %153 : vector<4xf32> to vector<4x1xf32>
    %155 = vector.broadcast %1 : f32 to vector<4x1xf32>
    %156 = arith.addf %154, %155 : vector<4x1xf32>
    %c1_58 = arith.constant 1 : index
    %c0_59 = arith.constant 0 : index
    %c0_60 = arith.constant 0 : index
    %157 = vector.load %arg2[%c1_58, %c0_59, %c0_60] : memref<8x4x1xf32, #tpu.memory_space<vmem>>, vector<1x4x1xf32>
    %158 = vector.shape_cast %157 : vector<1x4x1xf32> to vector<4x1xf32>
    %159 = arith.mulf %156, %158 : vector<4x1xf32>
    %160 = arith.addf %83, %159 : vector<4x1xf32>
    %c2_61 = arith.constant 2 : index
    %c0_62 = arith.constant 0 : index
    %c0_63 = arith.constant 0 : index
    %161 = vector.load %arg1[%c2_61, %c0_62, %c0_63] : memref<8x4x20xf32, #tpu.memory_space<vmem>>, vector<1x4x20xf32>
    %162 = vector.shape_cast %161 : vector<1x4x20xf32> to vector<4x20xf32>
    %cst_64 = arith.constant dense<0.000000e+00> : vector<4x32xf32>
    %163 = tpu.matmul %162, %3, %cst_64 {dimension_numbers = #tpu.dot_dimension_numbers<[1], [0], [0], [1], [0, 0, 1, 1], [], []>} : vector<4x20xf32>, vector<20x32xf32>, vector<4x32xf32> -> vector<4x32xf32>
    %164 = vector.broadcast %4 : vector<1x32xf32> to vector<4x32xf32>
    %165 = arith.addf %163, %164 : vector<4x32xf32>
    %cst_65 = arith.constant dense<0.000000e+00> : vector<4xf32>
    %166 = vector.multi_reduction <add>, %165, %cst_65 [1] : vector<4x32xf32> to vector<4xf32>
    %167 = vector.shape_cast %166 : vector<4xf32> to vector<4x1xf32>
    %cst_66 = arith.constant 3.200000e+01 : f32
    %168 = vector.broadcast %cst_66 : f32 to vector<4x1xf32>
    %169 = arith.divf %167, %168 : vector<4x1xf32>
    %170 = vector.broadcast %169 : vector<4x1xf32> to vector<4x32xf32>
    %171 = arith.subf %165, %170 : vector<4x32xf32>
    %172 = arith.mulf %171, %171 : vector<4x32xf32>
    %cst_67 = arith.constant dense<0.000000e+00> : vector<4xf32>
    %173 = vector.multi_reduction <add>, %172, %cst_67 [1] : vector<4x32xf32> to vector<4xf32>
    %174 = vector.shape_cast %173 : vector<4xf32> to vector<4x1xf32>
    %cst_68 = arith.constant 3.200000e+01 : f32
    %175 = vector.broadcast %cst_68 : f32 to vector<4x1xf32>
    %176 = arith.divf %174, %175 : vector<4x1xf32>
    %177 = vector.broadcast %169 : vector<4x1xf32> to vector<4x32xf32>
    %178 = arith.subf %165, %177 : vector<4x32xf32>
    %cst_69 = arith.constant 9.99999974E-6 : f32
    %179 = vector.broadcast %cst_69 : f32 to vector<4x1xf32>
    %180 = arith.addf %176, %179 : vector<4x1xf32>
    %181 = math.rsqrt %180 : vector<4x1xf32>
    %182 = vector.broadcast %181 : vector<4x1xf32> to vector<4x32xf32>
    %183 = arith.mulf %178, %182 : vector<4x32xf32>
    %184 = vector.broadcast %5 : vector<1x32xf32> to vector<4x32xf32>
    %185 = arith.mulf %183, %184 : vector<4x32xf32>
    %186 = vector.broadcast %6 : vector<1x32xf32> to vector<4x32xf32>
    %187 = arith.addf %185, %186 : vector<4x32xf32>
    %cst_70 = arith.constant 5.000000e-01 : f32
    %188 = vector.broadcast %cst_70 : f32 to vector<4x32xf32>
    %189 = arith.mulf %187, %188 : vector<4x32xf32>
    %cst_71 = arith.constant 0.707106769 : f32
    %190 = vector.broadcast %cst_71 : f32 to vector<4x32xf32>
    %191 = arith.mulf %187, %190 : vector<4x32xf32>
    %192 = math.absf %191 : vector<4x32xf32>
    %cst_72 = arith.constant 0.327591091 : f32
    %193 = vector.broadcast %cst_72 : f32 to vector<4x32xf32>
    %194 = arith.mulf %193, %192 : vector<4x32xf32>
    %cst_73 = arith.constant 1.000000e+00 : f32
    %195 = vector.broadcast %cst_73 : f32 to vector<4x32xf32>
    %196 = arith.addf %195, %194 : vector<4x32xf32>
    %cst_74 = arith.constant 1.000000e+00 : f32
    %197 = vector.broadcast %cst_74 : f32 to vector<4x32xf32>
    %198 = arith.divf %197, %196 : vector<4x32xf32>
    %cst_75 = arith.constant 1.06140542 : f32
    %199 = vector.broadcast %cst_75 : f32 to vector<4x32xf32>
    %200 = arith.mulf %198, %199 : vector<4x32xf32>
    %cst_76 = arith.constant -1.45315206 : f32
    %201 = vector.broadcast %cst_76 : f32 to vector<4x32xf32>
    %202 = arith.addf %201, %200 : vector<4x32xf32>
    %203 = arith.mulf %198, %202 : vector<4x32xf32>
    %cst_77 = arith.constant 1.42141378 : f32
    %204 = vector.broadcast %cst_77 : f32 to vector<4x32xf32>
    %205 = arith.addf %204, %203 : vector<4x32xf32>
    %206 = arith.mulf %198, %205 : vector<4x32xf32>
    %cst_78 = arith.constant -0.284496725 : f32
    %207 = vector.broadcast %cst_78 : f32 to vector<4x32xf32>
    %208 = arith.addf %207, %206 : vector<4x32xf32>
    %209 = arith.mulf %198, %208 : vector<4x32xf32>
    %cst_79 = arith.constant 0.254829586 : f32
    %210 = vector.broadcast %cst_79 : f32 to vector<4x32xf32>
    %211 = arith.addf %210, %209 : vector<4x32xf32>
    %212 = arith.mulf %198, %211 : vector<4x32xf32>
    %cst_80 = arith.constant 0.000000e+00 : f32
    %213 = vector.broadcast %cst_80 : f32 to vector<4x32xf32>
    %214 = arith.subf %213, %192 : vector<4x32xf32>
    %215 = arith.mulf %214, %192 : vector<4x32xf32>
    %216 = math.exp %215 : vector<4x32xf32>
    %217 = arith.mulf %212, %216 : vector<4x32xf32>
    %cst_81 = arith.constant 1.000000e+00 : f32
    %218 = vector.broadcast %cst_81 : f32 to vector<4x32xf32>
    %219 = arith.subf %218, %217 : vector<4x32xf32>
    %cst_82 = arith.constant 0.000000e+00 : f32
    %220 = vector.broadcast %cst_82 : f32 to vector<4x32xf32>
    %221 = arith.cmpf olt, %191, %220 : vector<4x32xf32>
    %cst_83 = arith.constant 0.000000e+00 : f32
    %222 = vector.broadcast %cst_83 : f32 to vector<4x32xf32>
    %223 = arith.subf %222, %219 : vector<4x32xf32>
    %224 = arith.select %221, %223, %219 : vector<4x32xi1>, vector<4x32xf32>
    %cst_84 = arith.constant 1.000000e+00 : f32
    %225 = vector.broadcast %cst_84 : f32 to vector<4x32xf32>
    %226 = arith.addf %225, %224 : vector<4x32xf32>
    %227 = arith.mulf %189, %226 : vector<4x32xf32>
    %228 = vector.broadcast %7 : vector<1x32xf32> to vector<4x32xf32>
    %229 = arith.mulf %227, %228 : vector<4x32xf32>
    %cst_85 = arith.constant dense<0.000000e+00> : vector<4xf32>
    %230 = vector.multi_reduction <add>, %229, %cst_85 [1] : vector<4x32xf32> to vector<4xf32>
    %231 = vector.shape_cast %230 : vector<4xf32> to vector<4x1xf32>
    %232 = vector.broadcast %1 : f32 to vector<4x1xf32>
    %233 = arith.addf %231, %232 : vector<4x1xf32>
    %c2_86 = arith.constant 2 : index
    %c0_87 = arith.constant 0 : index
    %c0_88 = arith.constant 0 : index
    %234 = vector.load %arg2[%c2_86, %c0_87, %c0_88] : memref<8x4x1xf32, #tpu.memory_space<vmem>>, vector<1x4x1xf32>
    %235 = vector.shape_cast %234 : vector<1x4x1xf32> to vector<4x1xf32>
    %236 = arith.mulf %233, %235 : vector<4x1xf32>
    %237 = arith.addf %160, %236 : vector<4x1xf32>
    %c3 = arith.constant 3 : index
    %c0_89 = arith.constant 0 : index
    %c0_90 = arith.constant 0 : index
    %238 = vector.load %arg1[%c3, %c0_89, %c0_90] : memref<8x4x20xf32, #tpu.memory_space<vmem>>, vector<1x4x20xf32>
    %239 = vector.shape_cast %238 : vector<1x4x20xf32> to vector<4x20xf32>
    %cst_91 = arith.constant dense<0.000000e+00> : vector<4x32xf32>
    %240 = tpu.matmul %239, %3, %cst_91 {dimension_numbers = #tpu.dot_dimension_numbers<[1], [0], [0], [1], [0, 0, 1, 1], [], []>} : vector<4x20xf32>, vector<20x32xf32>, vector<4x32xf32> -> vector<4x32xf32>
    %241 = vector.broadcast %4 : vector<1x32xf32> to vector<4x32xf32>
    %242 = arith.addf %240, %241 : vector<4x32xf32>
    %cst_92 = arith.constant dense<0.000000e+00> : vector<4xf32>
    %243 = vector.multi_reduction <add>, %242, %cst_92 [1] : vector<4x32xf32> to vector<4xf32>
    %244 = vector.shape_cast %243 : vector<4xf32> to vector<4x1xf32>
    %cst_93 = arith.constant 3.200000e+01 : f32
    %245 = vector.broadcast %cst_93 : f32 to vector<4x1xf32>
    %246 = arith.divf %244, %245 : vector<4x1xf32>
    %247 = vector.broadcast %246 : vector<4x1xf32> to vector<4x32xf32>
    %248 = arith.subf %242, %247 : vector<4x32xf32>
    %249 = arith.mulf %248, %248 : vector<4x32xf32>
    %cst_94 = arith.constant dense<0.000000e+00> : vector<4xf32>
    %250 = vector.multi_reduction <add>, %249, %cst_94 [1] : vector<4x32xf32> to vector<4xf32>
    %251 = vector.shape_cast %250 : vector<4xf32> to vector<4x1xf32>
    %cst_95 = arith.constant 3.200000e+01 : f32
    %252 = vector.broadcast %cst_95 : f32 to vector<4x1xf32>
    %253 = arith.divf %251, %252 : vector<4x1xf32>
    %254 = vector.broadcast %246 : vector<4x1xf32> to vector<4x32xf32>
    %255 = arith.subf %242, %254 : vector<4x32xf32>
    %cst_96 = arith.constant 9.99999974E-6 : f32
    %256 = vector.broadcast %cst_96 : f32 to vector<4x1xf32>
    %257 = arith.addf %253, %256 : vector<4x1xf32>
    %258 = math.rsqrt %257 : vector<4x1xf32>
    %259 = vector.broadcast %258 : vector<4x1xf32> to vector<4x32xf32>
    %260 = arith.mulf %255, %259 : vector<4x32xf32>
    %261 = vector.broadcast %5 : vector<1x32xf32> to vector<4x32xf32>
    %262 = arith.mulf %260, %261 : vector<4x32xf32>
    %263 = vector.broadcast %6 : vector<1x32xf32> to vector<4x32xf32>
    %264 = arith.addf %262, %263 : vector<4x32xf32>
    %cst_97 = arith.constant 5.000000e-01 : f32
    %265 = vector.broadcast %cst_97 : f32 to vector<4x32xf32>
    %266 = arith.mulf %264, %265 : vector<4x32xf32>
    %cst_98 = arith.constant 0.707106769 : f32
    %267 = vector.broadcast %cst_98 : f32 to vector<4x32xf32>
    %268 = arith.mulf %264, %267 : vector<4x32xf32>
    %269 = math.absf %268 : vector<4x32xf32>
    %cst_99 = arith.constant 0.327591091 : f32
    %270 = vector.broadcast %cst_99 : f32 to vector<4x32xf32>
    %271 = arith.mulf %270, %269 : vector<4x32xf32>
    %cst_100 = arith.constant 1.000000e+00 : f32
    %272 = vector.broadcast %cst_100 : f32 to vector<4x32xf32>
    %273 = arith.addf %272, %271 : vector<4x32xf32>
    %cst_101 = arith.constant 1.000000e+00 : f32
    %274 = vector.broadcast %cst_101 : f32 to vector<4x32xf32>
    %275 = arith.divf %274, %273 : vector<4x32xf32>
    %cst_102 = arith.constant 1.06140542 : f32
    %276 = vector.broadcast %cst_102 : f32 to vector<4x32xf32>
    %277 = arith.mulf %275, %276 : vector<4x32xf32>
    %cst_103 = arith.constant -1.45315206 : f32
    %278 = vector.broadcast %cst_103 : f32 to vector<4x32xf32>
    %279 = arith.addf %278, %277 : vector<4x32xf32>
    %280 = arith.mulf %275, %279 : vector<4x32xf32>
    %cst_104 = arith.constant 1.42141378 : f32
    %281 = vector.broadcast %cst_104 : f32 to vector<4x32xf32>
    %282 = arith.addf %281, %280 : vector<4x32xf32>
    %283 = arith.mulf %275, %282 : vector<4x32xf32>
    %cst_105 = arith.constant -0.284496725 : f32
    %284 = vector.broadcast %cst_105 : f32 to vector<4x32xf32>
    %285 = arith.addf %284, %283 : vector<4x32xf32>
    %286 = arith.mulf %275, %285 : vector<4x32xf32>
    %cst_106 = arith.constant 0.254829586 : f32
    %287 = vector.broadcast %cst_106 : f32 to vector<4x32xf32>
    %288 = arith.addf %287, %286 : vector<4x32xf32>
    %289 = arith.mulf %275, %288 : vector<4x32xf32>
    %cst_107 = arith.constant 0.000000e+00 : f32
    %290 = vector.broadcast %cst_107 : f32 to vector<4x32xf32>
    %291 = arith.subf %290, %269 : vector<4x32xf32>
    %292 = arith.mulf %291, %269 : vector<4x32xf32>
    %293 = math.exp %292 : vector<4x32xf32>
    %294 = arith.mulf %289, %293 : vector<4x32xf32>
    %cst_108 = arith.constant 1.000000e+00 : f32
    %295 = vector.broadcast %cst_108 : f32 to vector<4x32xf32>
    %296 = arith.subf %295, %294 : vector<4x32xf32>
    %cst_109 = arith.constant 0.000000e+00 : f32
    %297 = vector.broadcast %cst_109 : f32 to vector<4x32xf32>
    %298 = arith.cmpf olt, %268, %297 : vector<4x32xf32>
    %cst_110 = arith.constant 0.000000e+00 : f32
    %299 = vector.broadcast %cst_110 : f32 to vector<4x32xf32>
    %300 = arith.subf %299, %296 : vector<4x32xf32>
    %301 = arith.select %298, %300, %296 : vector<4x32xi1>, vector<4x32xf32>
    %cst_111 = arith.constant 1.000000e+00 : f32
    %302 = vector.broadcast %cst_111 : f32 to vector<4x32xf32>
    %303 = arith.addf %302, %301 : vector<4x32xf32>
    %304 = arith.mulf %266, %303 : vector<4x32xf32>
    %305 = vector.broadcast %7 : vector<1x32xf32> to vector<4x32xf32>
    %306 = arith.mulf %304, %305 : vector<4x32xf32>
    %cst_112 = arith.constant dense<0.000000e+00> : vector<4xf32>
    %307 = vector.multi_reduction <add>, %306, %cst_112 [1] : vector<4x32xf32> to vector<4xf32>
    %308 = vector.shape_cast %307 : vector<4xf32> to vector<4x1xf32>
    %309 = vector.broadcast %1 : f32 to vector<4x1xf32>
    %310 = arith.addf %308, %309 : vector<4x1xf32>
    %c3_113 = arith.constant 3 : index
    %c0_114 = arith.constant 0 : index
    %c0_115 = arith.constant 0 : index
    %311 = vector.load %arg2[%c3_113, %c0_114, %c0_115] : memref<8x4x1xf32, #tpu.memory_space<vmem>>, vector<1x4x1xf32>
    %312 = vector.shape_cast %311 : vector<1x4x1xf32> to vector<4x1xf32>
    %313 = arith.mulf %310, %312 : vector<4x1xf32>
    %314 = arith.addf %237, %313 : vector<4x1xf32>
    %c4 = arith.constant 4 : index
    %c0_116 = arith.constant 0 : index
    %c0_117 = arith.constant 0 : index
    %315 = vector.load %arg1[%c4, %c0_116, %c0_117] : memref<8x4x20xf32, #tpu.memory_space<vmem>>, vector<1x4x20xf32>
    %316 = vector.shape_cast %315 : vector<1x4x20xf32> to vector<4x20xf32>
    %cst_118 = arith.constant dense<0.000000e+00> : vector<4x32xf32>
    %317 = tpu.matmul %316, %3, %cst_118 {dimension_numbers = #tpu.dot_dimension_numbers<[1], [0], [0], [1], [0, 0, 1, 1], [], []>} : vector<4x20xf32>, vector<20x32xf32>, vector<4x32xf32> -> vector<4x32xf32>
    %318 = vector.broadcast %4 : vector<1x32xf32> to vector<4x32xf32>
    %319 = arith.addf %317, %318 : vector<4x32xf32>
    %cst_119 = arith.constant dense<0.000000e+00> : vector<4xf32>
    %320 = vector.multi_reduction <add>, %319, %cst_119 [1] : vector<4x32xf32> to vector<4xf32>
    %321 = vector.shape_cast %320 : vector<4xf32> to vector<4x1xf32>
    %cst_120 = arith.constant 3.200000e+01 : f32
    %322 = vector.broadcast %cst_120 : f32 to vector<4x1xf32>
    %323 = arith.divf %321, %322 : vector<4x1xf32>
    %324 = vector.broadcast %323 : vector<4x1xf32> to vector<4x32xf32>
    %325 = arith.subf %319, %324 : vector<4x32xf32>
    %326 = arith.mulf %325, %325 : vector<4x32xf32>
    %cst_121 = arith.constant dense<0.000000e+00> : vector<4xf32>
    %327 = vector.multi_reduction <add>, %326, %cst_121 [1] : vector<4x32xf32> to vector<4xf32>
    %328 = vector.shape_cast %327 : vector<4xf32> to vector<4x1xf32>
    %cst_122 = arith.constant 3.200000e+01 : f32
    %329 = vector.broadcast %cst_122 : f32 to vector<4x1xf32>
    %330 = arith.divf %328, %329 : vector<4x1xf32>
    %331 = vector.broadcast %323 : vector<4x1xf32> to vector<4x32xf32>
    %332 = arith.subf %319, %331 : vector<4x32xf32>
    %cst_123 = arith.constant 9.99999974E-6 : f32
    %333 = vector.broadcast %cst_123 : f32 to vector<4x1xf32>
    %334 = arith.addf %330, %333 : vector<4x1xf32>
    %335 = math.rsqrt %334 : vector<4x1xf32>
    %336 = vector.broadcast %335 : vector<4x1xf32> to vector<4x32xf32>
    %337 = arith.mulf %332, %336 : vector<4x32xf32>
    %338 = vector.broadcast %5 : vector<1x32xf32> to vector<4x32xf32>
    %339 = arith.mulf %337, %338 : vector<4x32xf32>
    %340 = vector.broadcast %6 : vector<1x32xf32> to vector<4x32xf32>
    %341 = arith.addf %339, %340 : vector<4x32xf32>
    %cst_124 = arith.constant 5.000000e-01 : f32
    %342 = vector.broadcast %cst_124 : f32 to vector<4x32xf32>
    %343 = arith.mulf %341, %342 : vector<4x32xf32>
    %cst_125 = arith.constant 0.707106769 : f32
    %344 = vector.broadcast %cst_125 : f32 to vector<4x32xf32>
    %345 = arith.mulf %341, %344 : vector<4x32xf32>
    %346 = math.absf %345 : vector<4x32xf32>
    %cst_126 = arith.constant 0.327591091 : f32
    %347 = vector.broadcast %cst_126 : f32 to vector<4x32xf32>
    %348 = arith.mulf %347, %346 : vector<4x32xf32>
    %cst_127 = arith.constant 1.000000e+00 : f32
    %349 = vector.broadcast %cst_127 : f32 to vector<4x32xf32>
    %350 = arith.addf %349, %348 : vector<4x32xf32>
    %cst_128 = arith.constant 1.000000e+00 : f32
    %351 = vector.broadcast %cst_128 : f32 to vector<4x32xf32>
    %352 = arith.divf %351, %350 : vector<4x32xf32>
    %cst_129 = arith.constant 1.06140542 : f32
    %353 = vector.broadcast %cst_129 : f32 to vector<4x32xf32>
    %354 = arith.mulf %352, %353 : vector<4x32xf32>
    %cst_130 = arith.constant -1.45315206 : f32
    %355 = vector.broadcast %cst_130 : f32 to vector<4x32xf32>
    %356 = arith.addf %355, %354 : vector<4x32xf32>
    %357 = arith.mulf %352, %356 : vector<4x32xf32>
    %cst_131 = arith.constant 1.42141378 : f32
    %358 = vector.broadcast %cst_131 : f32 to vector<4x32xf32>
    %359 = arith.addf %358, %357 : vector<4x32xf32>
    %360 = arith.mulf %352, %359 : vector<4x32xf32>
    %cst_132 = arith.constant -0.284496725 : f32
    %361 = vector.broadcast %cst_132 : f32 to vector<4x32xf32>
    %362 = arith.addf %361, %360 : vector<4x32xf32>
    %363 = arith.mulf %352, %362 : vector<4x32xf32>
    %cst_133 = arith.constant 0.254829586 : f32
    %364 = vector.broadcast %cst_133 : f32 to vector<4x32xf32>
    %365 = arith.addf %364, %363 : vector<4x32xf32>
    %366 = arith.mulf %352, %365 : vector<4x32xf32>
    %cst_134 = arith.constant 0.000000e+00 : f32
    %367 = vector.broadcast %cst_134 : f32 to vector<4x32xf32>
    %368 = arith.subf %367, %346 : vector<4x32xf32>
    %369 = arith.mulf %368, %346 : vector<4x32xf32>
    %370 = math.exp %369 : vector<4x32xf32>
    %371 = arith.mulf %366, %370 : vector<4x32xf32>
    %cst_135 = arith.constant 1.000000e+00 : f32
    %372 = vector.broadcast %cst_135 : f32 to vector<4x32xf32>
    %373 = arith.subf %372, %371 : vector<4x32xf32>
    %cst_136 = arith.constant 0.000000e+00 : f32
    %374 = vector.broadcast %cst_136 : f32 to vector<4x32xf32>
    %375 = arith.cmpf olt, %345, %374 : vector<4x32xf32>
    %cst_137 = arith.constant 0.000000e+00 : f32
    %376 = vector.broadcast %cst_137 : f32 to vector<4x32xf32>
    %377 = arith.subf %376, %373 : vector<4x32xf32>
    %378 = arith.select %375, %377, %373 : vector<4x32xi1>, vector<4x32xf32>
    %cst_138 = arith.constant 1.000000e+00 : f32
    %379 = vector.broadcast %cst_138 : f32 to vector<4x32xf32>
    %380 = arith.addf %379, %378 : vector<4x32xf32>
    %381 = arith.mulf %343, %380 : vector<4x32xf32>
    %382 = vector.broadcast %7 : vector<1x32xf32> to vector<4x32xf32>
    %383 = arith.mulf %381, %382 : vector<4x32xf32>
    %cst_139 = arith.constant dense<0.000000e+00> : vector<4xf32>
    %384 = vector.multi_reduction <add>, %383, %cst_139 [1] : vector<4x32xf32> to vector<4xf32>
    %385 = vector.shape_cast %384 : vector<4xf32> to vector<4x1xf32>
    %386 = vector.broadcast %1 : f32 to vector<4x1xf32>
    %387 = arith.addf %385, %386 : vector<4x1xf32>
    %c4_140 = arith.constant 4 : index
    %c0_141 = arith.constant 0 : index
    %c0_142 = arith.constant 0 : index
    %388 = vector.load %arg2[%c4_140, %c0_141, %c0_142] : memref<8x4x1xf32, #tpu.memory_space<vmem>>, vector<1x4x1xf32>
    %389 = vector.shape_cast %388 : vector<1x4x1xf32> to vector<4x1xf32>
    %390 = arith.mulf %387, %389 : vector<4x1xf32>
    %391 = arith.addf %314, %390 : vector<4x1xf32>
    %c5 = arith.constant 5 : index
    %c0_143 = arith.constant 0 : index
    %c0_144 = arith.constant 0 : index
    %392 = vector.load %arg1[%c5, %c0_143, %c0_144] : memref<8x4x20xf32, #tpu.memory_space<vmem>>, vector<1x4x20xf32>
    %393 = vector.shape_cast %392 : vector<1x4x20xf32> to vector<4x20xf32>
    %cst_145 = arith.constant dense<0.000000e+00> : vector<4x32xf32>
    %394 = tpu.matmul %393, %3, %cst_145 {dimension_numbers = #tpu.dot_dimension_numbers<[1], [0], [0], [1], [0, 0, 1, 1], [], []>} : vector<4x20xf32>, vector<20x32xf32>, vector<4x32xf32> -> vector<4x32xf32>
    %395 = vector.broadcast %4 : vector<1x32xf32> to vector<4x32xf32>
    %396 = arith.addf %394, %395 : vector<4x32xf32>
    %cst_146 = arith.constant dense<0.000000e+00> : vector<4xf32>
    %397 = vector.multi_reduction <add>, %396, %cst_146 [1] : vector<4x32xf32> to vector<4xf32>
    %398 = vector.shape_cast %397 : vector<4xf32> to vector<4x1xf32>
    %cst_147 = arith.constant 3.200000e+01 : f32
    %399 = vector.broadcast %cst_147 : f32 to vector<4x1xf32>
    %400 = arith.divf %398, %399 : vector<4x1xf32>
    %401 = vector.broadcast %400 : vector<4x1xf32> to vector<4x32xf32>
    %402 = arith.subf %396, %401 : vector<4x32xf32>
    %403 = arith.mulf %402, %402 : vector<4x32xf32>
    %cst_148 = arith.constant dense<0.000000e+00> : vector<4xf32>
    %404 = vector.multi_reduction <add>, %403, %cst_148 [1] : vector<4x32xf32> to vector<4xf32>
    %405 = vector.shape_cast %404 : vector<4xf32> to vector<4x1xf32>
    %cst_149 = arith.constant 3.200000e+01 : f32
    %406 = vector.broadcast %cst_149 : f32 to vector<4x1xf32>
    %407 = arith.divf %405, %406 : vector<4x1xf32>
    %408 = vector.broadcast %400 : vector<4x1xf32> to vector<4x32xf32>
    %409 = arith.subf %396, %408 : vector<4x32xf32>
    %cst_150 = arith.constant 9.99999974E-6 : f32
    %410 = vector.broadcast %cst_150 : f32 to vector<4x1xf32>
    %411 = arith.addf %407, %410 : vector<4x1xf32>
    %412 = math.rsqrt %411 : vector<4x1xf32>
    %413 = vector.broadcast %412 : vector<4x1xf32> to vector<4x32xf32>
    %414 = arith.mulf %409, %413 : vector<4x32xf32>
    %415 = vector.broadcast %5 : vector<1x32xf32> to vector<4x32xf32>
    %416 = arith.mulf %414, %415 : vector<4x32xf32>
    %417 = vector.broadcast %6 : vector<1x32xf32> to vector<4x32xf32>
    %418 = arith.addf %416, %417 : vector<4x32xf32>
    %cst_151 = arith.constant 5.000000e-01 : f32
    %419 = vector.broadcast %cst_151 : f32 to vector<4x32xf32>
    %420 = arith.mulf %418, %419 : vector<4x32xf32>
    %cst_152 = arith.constant 0.707106769 : f32
    %421 = vector.broadcast %cst_152 : f32 to vector<4x32xf32>
    %422 = arith.mulf %418, %421 : vector<4x32xf32>
    %423 = math.absf %422 : vector<4x32xf32>
    %cst_153 = arith.constant 0.327591091 : f32
    %424 = vector.broadcast %cst_153 : f32 to vector<4x32xf32>
    %425 = arith.mulf %424, %423 : vector<4x32xf32>
    %cst_154 = arith.constant 1.000000e+00 : f32
    %426 = vector.broadcast %cst_154 : f32 to vector<4x32xf32>
    %427 = arith.addf %426, %425 : vector<4x32xf32>
    %cst_155 = arith.constant 1.000000e+00 : f32
    %428 = vector.broadcast %cst_155 : f32 to vector<4x32xf32>
    %429 = arith.divf %428, %427 : vector<4x32xf32>
    %cst_156 = arith.constant 1.06140542 : f32
    %430 = vector.broadcast %cst_156 : f32 to vector<4x32xf32>
    %431 = arith.mulf %429, %430 : vector<4x32xf32>
    %cst_157 = arith.constant -1.45315206 : f32
    %432 = vector.broadcast %cst_157 : f32 to vector<4x32xf32>
    %433 = arith.addf %432, %431 : vector<4x32xf32>
    %434 = arith.mulf %429, %433 : vector<4x32xf32>
    %cst_158 = arith.constant 1.42141378 : f32
    %435 = vector.broadcast %cst_158 : f32 to vector<4x32xf32>
    %436 = arith.addf %435, %434 : vector<4x32xf32>
    %437 = arith.mulf %429, %436 : vector<4x32xf32>
    %cst_159 = arith.constant -0.284496725 : f32
    %438 = vector.broadcast %cst_159 : f32 to vector<4x32xf32>
    %439 = arith.addf %438, %437 : vector<4x32xf32>
    %440 = arith.mulf %429, %439 : vector<4x32xf32>
    %cst_160 = arith.constant 0.254829586 : f32
    %441 = vector.broadcast %cst_160 : f32 to vector<4x32xf32>
    %442 = arith.addf %441, %440 : vector<4x32xf32>
    %443 = arith.mulf %429, %442 : vector<4x32xf32>
    %cst_161 = arith.constant 0.000000e+00 : f32
    %444 = vector.broadcast %cst_161 : f32 to vector<4x32xf32>
    %445 = arith.subf %444, %423 : vector<4x32xf32>
    %446 = arith.mulf %445, %423 : vector<4x32xf32>
    %447 = math.exp %446 : vector<4x32xf32>
    %448 = arith.mulf %443, %447 : vector<4x32xf32>
    %cst_162 = arith.constant 1.000000e+00 : f32
    %449 = vector.broadcast %cst_162 : f32 to vector<4x32xf32>
    %450 = arith.subf %449, %448 : vector<4x32xf32>
    %cst_163 = arith.constant 0.000000e+00 : f32
    %451 = vector.broadcast %cst_163 : f32 to vector<4x32xf32>
    %452 = arith.cmpf olt, %422, %451 : vector<4x32xf32>
    %cst_164 = arith.constant 0.000000e+00 : f32
    %453 = vector.broadcast %cst_164 : f32 to vector<4x32xf32>
    %454 = arith.subf %453, %450 : vector<4x32xf32>
    %455 = arith.select %452, %454, %450 : vector<4x32xi1>, vector<4x32xf32>
    %cst_165 = arith.constant 1.000000e+00 : f32
    %456 = vector.broadcast %cst_165 : f32 to vector<4x32xf32>
    %457 = arith.addf %456, %455 : vector<4x32xf32>
    %458 = arith.mulf %420, %457 : vector<4x32xf32>
    %459 = vector.broadcast %7 : vector<1x32xf32> to vector<4x32xf32>
    %460 = arith.mulf %458, %459 : vector<4x32xf32>
    %cst_166 = arith.constant dense<0.000000e+00> : vector<4xf32>
    %461 = vector.multi_reduction <add>, %460, %cst_166 [1] : vector<4x32xf32> to vector<4xf32>
    %462 = vector.shape_cast %461 : vector<4xf32> to vector<4x1xf32>
    %463 = vector.broadcast %1 : f32 to vector<4x1xf32>
    %464 = arith.addf %462, %463 : vector<4x1xf32>
    %c5_167 = arith.constant 5 : index
    %c0_168 = arith.constant 0 : index
    %c0_169 = arith.constant 0 : index
    %465 = vector.load %arg2[%c5_167, %c0_168, %c0_169] : memref<8x4x1xf32, #tpu.memory_space<vmem>>, vector<1x4x1xf32>
    %466 = vector.shape_cast %465 : vector<1x4x1xf32> to vector<4x1xf32>
    %467 = arith.mulf %464, %466 : vector<4x1xf32>
    %468 = arith.addf %391, %467 : vector<4x1xf32>
    %c6 = arith.constant 6 : index
    %c0_170 = arith.constant 0 : index
    %c0_171 = arith.constant 0 : index
    %469 = vector.load %arg1[%c6, %c0_170, %c0_171] : memref<8x4x20xf32, #tpu.memory_space<vmem>>, vector<1x4x20xf32>
    %470 = vector.shape_cast %469 : vector<1x4x20xf32> to vector<4x20xf32>
    %cst_172 = arith.constant dense<0.000000e+00> : vector<4x32xf32>
    %471 = tpu.matmul %470, %3, %cst_172 {dimension_numbers = #tpu.dot_dimension_numbers<[1], [0], [0], [1], [0, 0, 1, 1], [], []>} : vector<4x20xf32>, vector<20x32xf32>, vector<4x32xf32> -> vector<4x32xf32>
    %472 = vector.broadcast %4 : vector<1x32xf32> to vector<4x32xf32>
    %473 = arith.addf %471, %472 : vector<4x32xf32>
    %cst_173 = arith.constant dense<0.000000e+00> : vector<4xf32>
    %474 = vector.multi_reduction <add>, %473, %cst_173 [1] : vector<4x32xf32> to vector<4xf32>
    %475 = vector.shape_cast %474 : vector<4xf32> to vector<4x1xf32>
    %cst_174 = arith.constant 3.200000e+01 : f32
    %476 = vector.broadcast %cst_174 : f32 to vector<4x1xf32>
    %477 = arith.divf %475, %476 : vector<4x1xf32>
    %478 = vector.broadcast %477 : vector<4x1xf32> to vector<4x32xf32>
    %479 = arith.subf %473, %478 : vector<4x32xf32>
    %480 = arith.mulf %479, %479 : vector<4x32xf32>
    %cst_175 = arith.constant dense<0.000000e+00> : vector<4xf32>
    %481 = vector.multi_reduction <add>, %480, %cst_175 [1] : vector<4x32xf32> to vector<4xf32>
    %482 = vector.shape_cast %481 : vector<4xf32> to vector<4x1xf32>
    %cst_176 = arith.constant 3.200000e+01 : f32
    %483 = vector.broadcast %cst_176 : f32 to vector<4x1xf32>
    %484 = arith.divf %482, %483 : vector<4x1xf32>
    %485 = vector.broadcast %477 : vector<4x1xf32> to vector<4x32xf32>
    %486 = arith.subf %473, %485 : vector<4x32xf32>
    %cst_177 = arith.constant 9.99999974E-6 : f32
    %487 = vector.broadcast %cst_177 : f32 to vector<4x1xf32>
    %488 = arith.addf %484, %487 : vector<4x1xf32>
    %489 = math.rsqrt %488 : vector<4x1xf32>
    %490 = vector.broadcast %489 : vector<4x1xf32> to vector<4x32xf32>
    %491 = arith.mulf %486, %490 : vector<4x32xf32>
    %492 = vector.broadcast %5 : vector<1x32xf32> to vector<4x32xf32>
    %493 = arith.mulf %491, %492 : vector<4x32xf32>
    %494 = vector.broadcast %6 : vector<1x32xf32> to vector<4x32xf32>
    %495 = arith.addf %493, %494 : vector<4x32xf32>
    %cst_178 = arith.constant 5.000000e-01 : f32
    %496 = vector.broadcast %cst_178 : f32 to vector<4x32xf32>
    %497 = arith.mulf %495, %496 : vector<4x32xf32>
    %cst_179 = arith.constant 0.707106769 : f32
    %498 = vector.broadcast %cst_179 : f32 to vector<4x32xf32>
    %499 = arith.mulf %495, %498 : vector<4x32xf32>
    %500 = math.absf %499 : vector<4x32xf32>
    %cst_180 = arith.constant 0.327591091 : f32
    %501 = vector.broadcast %cst_180 : f32 to vector<4x32xf32>
    %502 = arith.mulf %501, %500 : vector<4x32xf32>
    %cst_181 = arith.constant 1.000000e+00 : f32
    %503 = vector.broadcast %cst_181 : f32 to vector<4x32xf32>
    %504 = arith.addf %503, %502 : vector<4x32xf32>
    %cst_182 = arith.constant 1.000000e+00 : f32
    %505 = vector.broadcast %cst_182 : f32 to vector<4x32xf32>
    %506 = arith.divf %505, %504 : vector<4x32xf32>
    %cst_183 = arith.constant 1.06140542 : f32
    %507 = vector.broadcast %cst_183 : f32 to vector<4x32xf32>
    %508 = arith.mulf %506, %507 : vector<4x32xf32>
    %cst_184 = arith.constant -1.45315206 : f32
    %509 = vector.broadcast %cst_184 : f32 to vector<4x32xf32>
    %510 = arith.addf %509, %508 : vector<4x32xf32>
    %511 = arith.mulf %506, %510 : vector<4x32xf32>
    %cst_185 = arith.constant 1.42141378 : f32
    %512 = vector.broadcast %cst_185 : f32 to vector<4x32xf32>
    %513 = arith.addf %512, %511 : vector<4x32xf32>
    %514 = arith.mulf %506, %513 : vector<4x32xf32>
    %cst_186 = arith.constant -0.284496725 : f32
    %515 = vector.broadcast %cst_186 : f32 to vector<4x32xf32>
    %516 = arith.addf %515, %514 : vector<4x32xf32>
    %517 = arith.mulf %506, %516 : vector<4x32xf32>
    %cst_187 = arith.constant 0.254829586 : f32
    %518 = vector.broadcast %cst_187 : f32 to vector<4x32xf32>
    %519 = arith.addf %518, %517 : vector<4x32xf32>
    %520 = arith.mulf %506, %519 : vector<4x32xf32>
    %cst_188 = arith.constant 0.000000e+00 : f32
    %521 = vector.broadcast %cst_188 : f32 to vector<4x32xf32>
    %522 = arith.subf %521, %500 : vector<4x32xf32>
    %523 = arith.mulf %522, %500 : vector<4x32xf32>
    %524 = math.exp %523 : vector<4x32xf32>
    %525 = arith.mulf %520, %524 : vector<4x32xf32>
    %cst_189 = arith.constant 1.000000e+00 : f32
    %526 = vector.broadcast %cst_189 : f32 to vector<4x32xf32>
    %527 = arith.subf %526, %525 : vector<4x32xf32>
    %cst_190 = arith.constant 0.000000e+00 : f32
    %528 = vector.broadcast %cst_190 : f32 to vector<4x32xf32>
    %529 = arith.cmpf olt, %499, %528 : vector<4x32xf32>
    %cst_191 = arith.constant 0.000000e+00 : f32
    %530 = vector.broadcast %cst_191 : f32 to vector<4x32xf32>
    %531 = arith.subf %530, %527 : vector<4x32xf32>
    %532 = arith.select %529, %531, %527 : vector<4x32xi1>, vector<4x32xf32>
    %cst_192 = arith.constant 1.000000e+00 : f32
    %533 = vector.broadcast %cst_192 : f32 to vector<4x32xf32>
    %534 = arith.addf %533, %532 : vector<4x32xf32>
    %535 = arith.mulf %497, %534 : vector<4x32xf32>
    %536 = vector.broadcast %7 : vector<1x32xf32> to vector<4x32xf32>
    %537 = arith.mulf %535, %536 : vector<4x32xf32>
    %cst_193 = arith.constant dense<0.000000e+00> : vector<4xf32>
    %538 = vector.multi_reduction <add>, %537, %cst_193 [1] : vector<4x32xf32> to vector<4xf32>
    %539 = vector.shape_cast %538 : vector<4xf32> to vector<4x1xf32>
    %540 = vector.broadcast %1 : f32 to vector<4x1xf32>
    %541 = arith.addf %539, %540 : vector<4x1xf32>
    %c6_194 = arith.constant 6 : index
    %c0_195 = arith.constant 0 : index
    %c0_196 = arith.constant 0 : index
    %542 = vector.load %arg2[%c6_194, %c0_195, %c0_196] : memref<8x4x1xf32, #tpu.memory_space<vmem>>, vector<1x4x1xf32>
    %543 = vector.shape_cast %542 : vector<1x4x1xf32> to vector<4x1xf32>
    %544 = arith.mulf %541, %543 : vector<4x1xf32>
    %545 = arith.addf %468, %544 : vector<4x1xf32>
    %c7 = arith.constant 7 : index
    %c0_197 = arith.constant 0 : index
    %c0_198 = arith.constant 0 : index
    %546 = vector.load %arg1[%c7, %c0_197, %c0_198] : memref<8x4x20xf32, #tpu.memory_space<vmem>>, vector<1x4x20xf32>
    %547 = vector.shape_cast %546 : vector<1x4x20xf32> to vector<4x20xf32>
    %cst_199 = arith.constant dense<0.000000e+00> : vector<4x32xf32>
    %548 = tpu.matmul %547, %3, %cst_199 {dimension_numbers = #tpu.dot_dimension_numbers<[1], [0], [0], [1], [0, 0, 1, 1], [], []>} : vector<4x20xf32>, vector<20x32xf32>, vector<4x32xf32> -> vector<4x32xf32>
    %549 = vector.broadcast %4 : vector<1x32xf32> to vector<4x32xf32>
    %550 = arith.addf %548, %549 : vector<4x32xf32>
    %cst_200 = arith.constant dense<0.000000e+00> : vector<4xf32>
    %551 = vector.multi_reduction <add>, %550, %cst_200 [1] : vector<4x32xf32> to vector<4xf32>
    %552 = vector.shape_cast %551 : vector<4xf32> to vector<4x1xf32>
    %cst_201 = arith.constant 3.200000e+01 : f32
    %553 = vector.broadcast %cst_201 : f32 to vector<4x1xf32>
    %554 = arith.divf %552, %553 : vector<4x1xf32>
    %555 = vector.broadcast %554 : vector<4x1xf32> to vector<4x32xf32>
    %556 = arith.subf %550, %555 : vector<4x32xf32>
    %557 = arith.mulf %556, %556 : vector<4x32xf32>
    %cst_202 = arith.constant dense<0.000000e+00> : vector<4xf32>
    %558 = vector.multi_reduction <add>, %557, %cst_202 [1] : vector<4x32xf32> to vector<4xf32>
    %559 = vector.shape_cast %558 : vector<4xf32> to vector<4x1xf32>
    %cst_203 = arith.constant 3.200000e+01 : f32
    %560 = vector.broadcast %cst_203 : f32 to vector<4x1xf32>
    %561 = arith.divf %559, %560 : vector<4x1xf32>
    %562 = vector.broadcast %554 : vector<4x1xf32> to vector<4x32xf32>
    %563 = arith.subf %550, %562 : vector<4x32xf32>
    %cst_204 = arith.constant 9.99999974E-6 : f32
    %564 = vector.broadcast %cst_204 : f32 to vector<4x1xf32>
    %565 = arith.addf %561, %564 : vector<4x1xf32>
    %566 = math.rsqrt %565 : vector<4x1xf32>
    %567 = vector.broadcast %566 : vector<4x1xf32> to vector<4x32xf32>
    %568 = arith.mulf %563, %567 : vector<4x32xf32>
    %569 = vector.broadcast %5 : vector<1x32xf32> to vector<4x32xf32>
    %570 = arith.mulf %568, %569 : vector<4x32xf32>
    %571 = vector.broadcast %6 : vector<1x32xf32> to vector<4x32xf32>
    %572 = arith.addf %570, %571 : vector<4x32xf32>
    %cst_205 = arith.constant 5.000000e-01 : f32
    %573 = vector.broadcast %cst_205 : f32 to vector<4x32xf32>
    %574 = arith.mulf %572, %573 : vector<4x32xf32>
    %cst_206 = arith.constant 0.707106769 : f32
    %575 = vector.broadcast %cst_206 : f32 to vector<4x32xf32>
    %576 = arith.mulf %572, %575 : vector<4x32xf32>
    %577 = math.absf %576 : vector<4x32xf32>
    %cst_207 = arith.constant 0.327591091 : f32
    %578 = vector.broadcast %cst_207 : f32 to vector<4x32xf32>
    %579 = arith.mulf %578, %577 : vector<4x32xf32>
    %cst_208 = arith.constant 1.000000e+00 : f32
    %580 = vector.broadcast %cst_208 : f32 to vector<4x32xf32>
    %581 = arith.addf %580, %579 : vector<4x32xf32>
    %cst_209 = arith.constant 1.000000e+00 : f32
    %582 = vector.broadcast %cst_209 : f32 to vector<4x32xf32>
    %583 = arith.divf %582, %581 : vector<4x32xf32>
    %cst_210 = arith.constant 1.06140542 : f32
    %584 = vector.broadcast %cst_210 : f32 to vector<4x32xf32>
    %585 = arith.mulf %583, %584 : vector<4x32xf32>
    %cst_211 = arith.constant -1.45315206 : f32
    %586 = vector.broadcast %cst_211 : f32 to vector<4x32xf32>
    %587 = arith.addf %586, %585 : vector<4x32xf32>
    %588 = arith.mulf %583, %587 : vector<4x32xf32>
    %cst_212 = arith.constant 1.42141378 : f32
    %589 = vector.broadcast %cst_212 : f32 to vector<4x32xf32>
    %590 = arith.addf %589, %588 : vector<4x32xf32>
    %591 = arith.mulf %583, %590 : vector<4x32xf32>
    %cst_213 = arith.constant -0.284496725 : f32
    %592 = vector.broadcast %cst_213 : f32 to vector<4x32xf32>
    %593 = arith.addf %592, %591 : vector<4x32xf32>
    %594 = arith.mulf %583, %593 : vector<4x32xf32>
    %cst_214 = arith.constant 0.254829586 : f32
    %595 = vector.broadcast %cst_214 : f32 to vector<4x32xf32>
    %596 = arith.addf %595, %594 : vector<4x32xf32>
    %597 = arith.mulf %583, %596 : vector<4x32xf32>
    %cst_215 = arith.constant 0.000000e+00 : f32
    %598 = vector.broadcast %cst_215 : f32 to vector<4x32xf32>
    %599 = arith.subf %598, %577 : vector<4x32xf32>
    %600 = arith.mulf %599, %577 : vector<4x32xf32>
    %601 = math.exp %600 : vector<4x32xf32>
    %602 = arith.mulf %597, %601 : vector<4x32xf32>
    %cst_216 = arith.constant 1.000000e+00 : f32
    %603 = vector.broadcast %cst_216 : f32 to vector<4x32xf32>
    %604 = arith.subf %603, %602 : vector<4x32xf32>
    %cst_217 = arith.constant 0.000000e+00 : f32
    %605 = vector.broadcast %cst_217 : f32 to vector<4x32xf32>
    %606 = arith.cmpf olt, %576, %605 : vector<4x32xf32>
    %cst_218 = arith.constant 0.000000e+00 : f32
    %607 = vector.broadcast %cst_218 : f32 to vector<4x32xf32>
    %608 = arith.subf %607, %604 : vector<4x32xf32>
    %609 = arith.select %606, %608, %604 : vector<4x32xi1>, vector<4x32xf32>
    %cst_219 = arith.constant 1.000000e+00 : f32
    %610 = vector.broadcast %cst_219 : f32 to vector<4x32xf32>
    %611 = arith.addf %610, %609 : vector<4x32xf32>
    %612 = arith.mulf %574, %611 : vector<4x32xf32>
    %613 = vector.broadcast %7 : vector<1x32xf32> to vector<4x32xf32>
    %614 = arith.mulf %612, %613 : vector<4x32xf32>
    %cst_220 = arith.constant dense<0.000000e+00> : vector<4xf32>
    %615 = vector.multi_reduction <add>, %614, %cst_220 [1] : vector<4x32xf32> to vector<4xf32>
    %616 = vector.shape_cast %615 : vector<4xf32> to vector<4x1xf32>
    %617 = vector.broadcast %1 : f32 to vector<4x1xf32>
    %618 = arith.addf %616, %617 : vector<4x1xf32>
    %c7_221 = arith.constant 7 : index
    %c0_222 = arith.constant 0 : index
    %c0_223 = arith.constant 0 : index
    %619 = vector.load %arg2[%c7_221, %c0_222, %c0_223] : memref<8x4x1xf32, #tpu.memory_space<vmem>>, vector<1x4x1xf32>
    %620 = vector.shape_cast %619 : vector<1x4x1xf32> to vector<4x1xf32>
    %621 = arith.mulf %618, %620 : vector<4x1xf32>
    %622 = arith.addf %545, %621 : vector<4x1xf32>
    %623 = vector.broadcast %0 : f32 to vector<4x1xf32>
    %624 = arith.mulf %622, %623 : vector<4x1xf32>
    %c0_224 = arith.constant 0 : index
    %c0_225 = arith.constant 0 : index
    %625 = vector.load %arg5[%c0_224, %c0_225] : memref<68x32xf32, #tpu.memory_space<vmem>>, vector<64x32xf32>
    %c64 = arith.constant 64 : index
    %c0_226 = arith.constant 0 : index
    %626 = vector.load %arg5[%c64, %c0_226] : memref<68x32xf32, #tpu.memory_space<vmem>>, vector<1x32xf32>
    %c65 = arith.constant 65 : index
    %c0_227 = arith.constant 0 : index
    %627 = vector.load %arg5[%c65, %c0_227] : memref<68x32xf32, #tpu.memory_space<vmem>>, vector<1x32xf32>
    %c66 = arith.constant 66 : index
    %c0_228 = arith.constant 0 : index
    %628 = vector.load %arg5[%c66, %c0_228] : memref<68x32xf32, #tpu.memory_space<vmem>>, vector<1x32xf32>
    %c67 = arith.constant 67 : index
    %c0_229 = arith.constant 0 : index
    %629 = vector.load %arg5[%c67, %c0_229] : memref<68x32xf32, #tpu.memory_space<vmem>>, vector<1x32xf32>
    %c0_230 = arith.constant 0 : index
    %c0_231 = arith.constant 0 : index
    %630 = vector.load %arg3[%c0_230, %c0_231] : memref<4x64xf32, #tpu.memory_space<vmem>>, vector<4x64xf32>
    %cst_232 = arith.constant dense<0.000000e+00> : vector<4x32xf32>
    %631 = tpu.matmul %630, %625, %cst_232 {dimension_numbers = #tpu.dot_dimension_numbers<[1], [0], [0], [1], [0, 0, 1, 1], [], []>} : vector<4x64xf32>, vector<64x32xf32>, vector<4x32xf32> -> vector<4x32xf32>
    %632 = vector.broadcast %626 : vector<1x32xf32> to vector<4x32xf32>
    %633 = arith.addf %631, %632 : vector<4x32xf32>
    %cst_233 = arith.constant dense<0.000000e+00> : vector<4xf32>
    %634 = vector.multi_reduction <add>, %633, %cst_233 [1] : vector<4x32xf32> to vector<4xf32>
    %635 = vector.shape_cast %634 : vector<4xf32> to vector<4x1xf32>
    %cst_234 = arith.constant 3.200000e+01 : f32
    %636 = vector.broadcast %cst_234 : f32 to vector<4x1xf32>
    %637 = arith.divf %635, %636 : vector<4x1xf32>
    %638 = vector.broadcast %637 : vector<4x1xf32> to vector<4x32xf32>
    %639 = arith.subf %633, %638 : vector<4x32xf32>
    %640 = arith.mulf %639, %639 : vector<4x32xf32>
    %cst_235 = arith.constant dense<0.000000e+00> : vector<4xf32>
    %641 = vector.multi_reduction <add>, %640, %cst_235 [1] : vector<4x32xf32> to vector<4xf32>
    %642 = vector.shape_cast %641 : vector<4xf32> to vector<4x1xf32>
    %cst_236 = arith.constant 3.200000e+01 : f32
    %643 = vector.broadcast %cst_236 : f32 to vector<4x1xf32>
    %644 = arith.divf %642, %643 : vector<4x1xf32>
    %645 = vector.broadcast %637 : vector<4x1xf32> to vector<4x32xf32>
    %646 = arith.subf %633, %645 : vector<4x32xf32>
    %cst_237 = arith.constant 9.99999974E-6 : f32
    %647 = vector.broadcast %cst_237 : f32 to vector<4x1xf32>
    %648 = arith.addf %644, %647 : vector<4x1xf32>
    %649 = math.rsqrt %648 : vector<4x1xf32>
    %650 = vector.broadcast %649 : vector<4x1xf32> to vector<4x32xf32>
    %651 = arith.mulf %646, %650 : vector<4x32xf32>
    %652 = vector.broadcast %627 : vector<1x32xf32> to vector<4x32xf32>
    %653 = arith.mulf %651, %652 : vector<4x32xf32>
    %654 = vector.broadcast %628 : vector<1x32xf32> to vector<4x32xf32>
    %655 = arith.addf %653, %654 : vector<4x32xf32>
    %cst_238 = arith.constant 5.000000e-01 : f32
    %656 = vector.broadcast %cst_238 : f32 to vector<4x32xf32>
    %657 = arith.mulf %655, %656 : vector<4x32xf32>
    %cst_239 = arith.constant 0.707106769 : f32
    %658 = vector.broadcast %cst_239 : f32 to vector<4x32xf32>
    %659 = arith.mulf %655, %658 : vector<4x32xf32>
    %660 = math.absf %659 : vector<4x32xf32>
    %cst_240 = arith.constant 0.327591091 : f32
    %661 = vector.broadcast %cst_240 : f32 to vector<4x32xf32>
    %662 = arith.mulf %661, %660 : vector<4x32xf32>
    %cst_241 = arith.constant 1.000000e+00 : f32
    %663 = vector.broadcast %cst_241 : f32 to vector<4x32xf32>
    %664 = arith.addf %663, %662 : vector<4x32xf32>
    %cst_242 = arith.constant 1.000000e+00 : f32
    %665 = vector.broadcast %cst_242 : f32 to vector<4x32xf32>
    %666 = arith.divf %665, %664 : vector<4x32xf32>
    %cst_243 = arith.constant 1.06140542 : f32
    %667 = vector.broadcast %cst_243 : f32 to vector<4x32xf32>
    %668 = arith.mulf %666, %667 : vector<4x32xf32>
    %cst_244 = arith.constant -1.45315206 : f32
    %669 = vector.broadcast %cst_244 : f32 to vector<4x32xf32>
    %670 = arith.addf %669, %668 : vector<4x32xf32>
    %671 = arith.mulf %666, %670 : vector<4x32xf32>
    %cst_245 = arith.constant 1.42141378 : f32
    %672 = vector.broadcast %cst_245 : f32 to vector<4x32xf32>
    %673 = arith.addf %672, %671 : vector<4x32xf32>
    %674 = arith.mulf %666, %673 : vector<4x32xf32>
    %cst_246 = arith.constant -0.284496725 : f32
    %675 = vector.broadcast %cst_246 : f32 to vector<4x32xf32>
    %676 = arith.addf %675, %674 : vector<4x32xf32>
    %677 = arith.mulf %666, %676 : vector<4x32xf32>
    %cst_247 = arith.constant 0.254829586 : f32
    %678 = vector.broadcast %cst_247 : f32 to vector<4x32xf32>
    %679 = arith.addf %678, %677 : vector<4x32xf32>
    %680 = arith.mulf %666, %679 : vector<4x32xf32>
    %cst_248 = arith.constant 0.000000e+00 : f32
    %681 = vector.broadcast %cst_248 : f32 to vector<4x32xf32>
    %682 = arith.subf %681, %660 : vector<4x32xf32>
    %683 = arith.mulf %682, %660 : vector<4x32xf32>
    %684 = math.exp %683 : vector<4x32xf32>
    %685 = arith.mulf %680, %684 : vector<4x32xf32>
    %cst_249 = arith.constant 1.000000e+00 : f32
    %686 = vector.broadcast %cst_249 : f32 to vector<4x32xf32>
    %687 = arith.subf %686, %685 : vector<4x32xf32>
    %cst_250 = arith.constant 0.000000e+00 : f32
    %688 = vector.broadcast %cst_250 : f32 to vector<4x32xf32>
    %689 = arith.cmpf olt, %659, %688 : vector<4x32xf32>
    %cst_251 = arith.constant 0.000000e+00 : f32
    %690 = vector.broadcast %cst_251 : f32 to vector<4x32xf32>
    %691 = arith.subf %690, %687 : vector<4x32xf32>
    %692 = arith.select %689, %691, %687 : vector<4x32xi1>, vector<4x32xf32>
    %cst_252 = arith.constant 1.000000e+00 : f32
    %693 = vector.broadcast %cst_252 : f32 to vector<4x32xf32>
    %694 = arith.addf %693, %692 : vector<4x32xf32>
    %695 = arith.mulf %657, %694 : vector<4x32xf32>
    %696 = vector.broadcast %629 : vector<1x32xf32> to vector<4x32xf32>
    %697 = arith.mulf %695, %696 : vector<4x32xf32>
    %cst_253 = arith.constant dense<0.000000e+00> : vector<4xf32>
    %698 = vector.multi_reduction <add>, %697, %cst_253 [1] : vector<4x32xf32> to vector<4xf32>
    %699 = vector.shape_cast %698 : vector<4xf32> to vector<4x1xf32>
    %700 = vector.broadcast %2 : f32 to vector<4x1xf32>
    %701 = arith.addf %699, %700 : vector<4x1xf32>
    %702 = arith.addf %701, %624 : vector<4x1xf32>
    %c0_254 = arith.constant 0 : index
    %c0_255 = arith.constant 0 : index
    %703 = vector.load %arg7[%c0_254, %c0_255] : memref<4x3xf32, #tpu.memory_space<vmem>>, vector<4x1xf32>
    tpu.vector_store %arg7[%c0_254, %c0_255], %702 {strides = array<i32>} : memref<4x3xf32, #tpu.memory_space<vmem>>, vector<4x1xf32>,
    %c0_256 = arith.constant 0 : index
    %c1_257 = arith.constant 1 : index
    %704 = vector.load %arg7[%c0_256, %c1_257] : memref<4x3xf32, #tpu.memory_space<vmem>>, vector<4x1xf32>
    tpu.vector_store %arg7[%c0_256, %c1_257], %701 {strides = array<i32>} : memref<4x3xf32, #tpu.memory_space<vmem>>, vector<4x1xf32>,
    %c0_258 = arith.constant 0 : index
    %c2_259 = arith.constant 2 : index
    %705 = vector.load %arg7[%c0_258, %c2_259] : memref<4x3xf32, #tpu.memory_space<vmem>>, vector<4x1xf32>
    tpu.vector_store %arg7[%c0_258, %c2_259], %624 {strides = array<i32>} : memref<4x3xf32, #tpu.memory_space<vmem>>, vector<4x1xf32>,
    return
  }
  func.func @transform_0(%arg0: i32) -> (i32, i32, i32) {
    %c0_i32 = arith.constant 0 : i32
    %c0_i32_0 = arith.constant 0 : i32
    %c0_i32_1 = arith.constant 0 : i32
    return %c0_i32, %arg0, %c0_i32_0 : i32, i32, i32
  }
  func.func @transform_1(%arg0: i32) -> (i32, i32, i32) {
    %c0_i32 = arith.constant 0 : i32
    %c0_i32_0 = arith.constant 0 : i32
    %c0_i32_1 = arith.constant 0 : i32
    return %c0_i32, %arg0, %c0_i32_0 : i32, i32, i32
  }
  func.func @transform_2(%arg0: i32) -> (i32, i32) {
    %c0_i32 = arith.constant 0 : i32
    %c0_i32_0 = arith.constant 0 : i32
    return %arg0, %c0_i32 : i32, i32
  }
  func.func @transform_3(%arg0: i32) -> (i32, i32) {
    %c0_i32 = arith.constant 0 : i32
    %c0_i32_0 = arith.constant 0 : i32
    %c0_i32_1 = arith.constant 0 : i32
    return %c0_i32, %c0_i32_0 : i32, i32
  }
  func.func @transform_4(%arg0: i32) -> (i32, i32) {
    %c0_i32 = arith.constant 0 : i32
    %c0_i32_0 = arith.constant 0 : i32
    %c0_i32_1 = arith.constant 0 : i32
    return %c0_i32, %c0_i32_0 : i32, i32
  }
  func.func @transform_5(%arg0: i32) -> i32 {
    %c0_i32 = arith.constant 0 : i32
    %c0_i32_0 = arith.constant 0 : i32
    return %c0_i32 : i32
  }
  func.func @transform_6(%arg0: i32) -> (i32, i32) {
    %c0_i32 = arith.constant 0 : i32
    %c0_i32_0 = arith.constant 0 : i32
    return %arg0, %c0_i32 : i32, i32
  }
}

</mosaic_0001>

<bundles_post_ra>
// kernel: squeeze.5
= control target key start
LH: loop header
LB: loop body
LE: loop exit
PB: predicated region body
PF: predicated region fallthrough
CT: control target
= control target key end

     0   :  { %s80_s0 = inlined_call_operand.vmem [shape: f32[4], index: 0, kind: input, shape index: {}]   ;;  %s81_s1 = inlined_call_operand.hbm [shape: f32[2,2], index: 1, kind: output, shape index: {}]  }
   0x1   :  { %v5_v0 = vld [vmem:[%s80_s0] sm:$0x1] }
   0x2   :  { %2 = vsyncpa [#allocation1], 0  ;;  %6 = vst [vmem:[#allocation3] sm:$0x1] %v5_v0  ;;  %vm8_vm0 = vcmask 15360   ;;  %s62_s0 = smov 126  }
   0x3   :  { %s63_s8 = smov [#allocation0]   ;;  %s27_s1 = sshll.u32 %s81_s1, 4  ;;  %s28_s1 = int_to_ptr.hbm [resolvable:$true] %s27_s1 }
   0x4   :  { %s25_s9 = sshll.u32 %s63_s8, 4  ;;  %s26_s9 = int_to_ptr.vmem [resolvable:$true] %s25_s9 }
   0x9   :  { %v10_v1 = vld [vmem:[#allocation3] sm:$0x1]  }
   0xa   :  { %v7_v2 = vld [vmem:[#allocation3] sm:$0x1]   ;;  %11 = vrot.lane.b32.xlu0 %v10_v1, %s62_s0 }
   0xb   :  { %9 = vst.msk [vmem:[#allocation2] sm:$0x1] %vm8_vm0, %v7_v2  }
  0x7c   :  { %v12_v3 = vpop.permute.xlu0 %11  }
  0x7d   :  { %15 = vst.msk [vmem:[#allocation2 + $0x1] sm:$0x1] %vm8_vm0, %v12_v3  }
  0x84   :  { %v18_v4 = vld [vmem:[#allocation2] sm:$0x3] }
  0x85   :  { %21 = vst [vmem:[#allocation0] sm:$0x3] %v18_v4 }
  0x86   :  { %30 = dma.vmem_to_hbm [thread:$0]  %s26_s9, 32, %s28_s1, [#allocation1]  }
  0x87   :  { %60 = dma.done.wait [#allocation1], 32  }
  0x88   :  { %61 = vsyncadd [#allocation1], 4294967264 }
  0x89   :  { %33 = vsyncpa [#allocation1], 1 }

// kernel: safe_forward.1
= control target key start
LH: loop header
LB: loop body
LE: loop exit
PB: predicated region body
PF: predicated region fallthrough
CT: control target
= control target key end

     0   :  { %11 = vsyncpa [#allocation3], 0  ;;  %s1088_s24 = smov [#allocation2]   ;;  %s1716_s0 = inlined_call_operand.vmem [shape: f32[8,4,20], index: 0, kind: input, shape index: {}]   ;;  %s1717_s1 = inlined_call_operand.vmem [shape: f32[8,4,1], index: 1, kind: input, shape index: {}]   ;;  %s1718_s2 = inlined_call_operand.vmem [shape: f32[4,64], index: 2, kind: input, shape index: {}]   ;;  %s1719_s3 = inlined_call_operand.vmem [shape: f32[24,32], index: 3, kind: input, shape index: {}]   ;;  %s1720_s4 = inlined_call_operand.vmem [shape: f32[68,32], index: 4, kind: input, shape index: {}]   ;;  %s1721_s5 = inlined_call_operand.vmem [shape: f32[4], index: 5, kind: input, shape index: {}]   ;;  %s1722_s6 = inlined_call_operand.vmem [shape: f32[4,3], index: 6, kind: output, shape index: {}]  }
   0x1   :  { %s27_s23 = sshll.u32 %s1721_s5, 4  ;;  %s28_s23 = int_to_ptr.vmem [resolvable:$true] %s27_s23 }
   0x2   :  { %30 = dma.vmem_to_smem %s28_s23, 16, %s1088_s24, [#allocation3]  }
   0x3   :  { %1086 = dma.done.wait [#allocation3], 16  }
   0x4   :  { %1087 = vsyncadd [#allocation3], 4294967280 }
   0x5   :  { %35 = sfence }
   0x6   :  { %v41_v0 = vld [vmem:[%s1719_s3 + $0x10] sm:$0xf]  ;;  %vm52_vm0 = vcmask 1043456   ;;  %v40_v1 = vld [vmem:[%s1719_s3 + $0x8] sm:$0xff]  ;;  %v39_v2 = vld [vmem:[%s1719_s3] sm:$0xff]  ;;  %vm48_vm1 = vcmask 162816  }
   0x7   :  { %976 = vmatpush.msk.msra.mxu1 %vm52_vm0, %v41_v0  ;;  %983 = vmatpush.msk.msra.mxu2 %vm52_vm0, %v41_v0  ;;  %v46_v3 = vld [vmem:[%s1716_s0] sm:$0xf]  ;;  %v982_v4 = vld [vmem:[%s1716_s0 + $0x8] sm:$0xf]  ;;  %v990_v5 = vld [vmem:[%s1716_s0 + $0x10] sm:$0xf] }
   0x8   :  { %991 = vmatpush.msk.msra.mxu0 %vm52_vm0, %v41_v0  ;;  %987 = vmatpush.msk.msra.mxu3 %vm52_vm0, %v41_v0  ;;  %v986_v6 = vld [vmem:[%s1716_s0 + $0xc] sm:$0xf]  ;;  %v854_v7 = vld [vmem:[%s1720_s4 + $0x38] sm:$0xff]  ;;  %v978_v8 = vld [vmem:[%s1716_s0 + $0x4] sm:$0xf]  ;;  %vm861_vm2 = vcmask 523264  }
   0x9   :  { %70 = vmatpush.msra.mxu1 %v40_v1  ;;  %276 = vmatpush.msra.mxu2 %v40_v1  ;;  %v998_v9 = vld [vmem:[%s1716_s0 + $0x18] sm:$0xf]  ;;  %v853_v10 = vld [vmem:[%s1720_s4 + $0x30] sm:$0xff]  ;;  %v1002_v11 = vld [vmem:[%s1716_s0 + $0x1c] sm:$0xf]  ;;  %vm76_vm3 = vcmask 257024  }
   0xa   :  { %472 = vmatpush.msra.mxu0 %v40_v1  ;;  %374 = vmatpush.msra.mxu3 %v40_v1  ;;  %v994_v12 = vld [vmem:[%s1716_s0 + $0x14] sm:$0xf]  ;;  %v852_v13 = vld [vmem:[%s1720_s4 + $0x28] sm:$0xff]  ;;  %v851_v14 = vld [vmem:[%s1720_s4 + $0x20] sm:$0xff]  ;;  %v1089_v45 = vmov 32.0   ;;  %s974_s28 = sld [smem:[#allocation2 + $0x1]] }
   0xb   :  { %71 = vmatpush.msra.mxu1 %v39_v2  ;;  %277 = vmatpush.msra.mxu2 %v39_v2  ;;  %v850_v15 = vld [vmem:[%s1720_s4 + $0x18] sm:$0xff]  ;;  %v849_v16 = vld [vmem:[%s1720_s4 + $0x10] sm:$0xff]  ;;  %v848_v17 = vld [vmem:[%s1720_s4 + $0x8] sm:$0xff]  ;;  %1018 = vrcp.f32 %v1089_v45  ;;  %s36_s14 = sld [smem:[#allocation2]]  ;;  %s1090_s18 = smov 2  }
   0xc   :  { %473 = vmatpush.msra.mxu0 %v39_v2  ;;  %977 = vmatmul.msk.f32.vlgmr.msra.gmra.mxu1 %vm48_vm1, %v46_v3  ;;  %v847_v18 = vld [vmem:[%s1720_s4] sm:$0xff]  ;;  %v1010_v20 = vld [vmem:[%s1719_s3 + $0x14] ss:$0 sm:$0xff]  ;;  %s975_s19 = sld [smem:[#allocation2 + $0x2]] }
   0xd   :  { %979 = vmatpush.msk.msrb.mxu1 %vm52_vm0, %v41_v0  ;;  %984 = vmatmul.msk.f32.vlgmr.msra.gmra.mxu2 %vm48_vm1, %v982_v4  ;;  %v859_v19 = vld [vmem:[%s1718_s2] sm:$0xf] }
   0xe   :  { %992 = vmatmul.msk.f32.vlgmr.msra.gmra.mxu0 %vm48_vm1, %v990_v5  ;;  %999 = vmatpush.msk.msrb.mxu2 %vm52_vm0, %v41_v0 }
   0xf   :  { %178 = vmatpush.msrb.mxu1 %v40_v1  ;;  %375 = vmatpush.msra.mxu3 %v39_v2 }
  0x10   :  { %668 = vmatpush.msrb.mxu2 %v40_v1  ;;  %988 = vmatmul.msk.f32.vlgmr.msra.gmra.mxu3 %vm48_vm1, %v986_v6 }
  0x11   :  { %179 = vmatpush.msrb.mxu1 %v39_v2  ;;  %1003 = vmatpush.msk.msrb.mxu3 %vm52_vm0, %v41_v0  ;;  %v1019_v46 = vpop.eup %1018 }
  0x12   :  { %669 = vmatpush.msrb.mxu2 %v39_v2  ;;  %873 = vmatpush.msrb.mxu0 %v854_v7  ;;  %v81_v47 = vmul.f32 32.0, %v1019_v46  ;;  %vm85_vm4 = vweird.f32 %v1019_v46 }
  0x13   :  { %995 = vmatpush.msk.msra.mxu1 %vm52_vm0, %v41_v0  ;;  %766 = vmatpush.msrb.mxu3 %v40_v1 }
  0x14   :  { %980 = vmatmul.msk.f32.vlgmr.msrb.gmra.mxu1 %vm48_vm1, %v978_v8  ;;  %874 = vmatpush.msrb.mxu0 %v853_v10  ;;  %v82_v48 = vsub.f32 1.0, %v81_v47 }
  0x15   :  { %1000 = vmatmul.msk.f32.vlgmr.msrb.gmra.mxu2 %vm48_vm1, %v998_v9  ;;  %570 = vmatpush.msra.mxu1 %v40_v1 }
  0x16   :  { %767 = vmatpush.msrb.mxu3 %v39_v2  ;;  %875 = vmatpush.msrb.mxu0 %v852_v13  ;;  %v83_v49 = vmul.f32 %v1019_v46, %v82_v48 }
  0x17   :  { %571 = vmatpush.msra.mxu1 %v39_v2  ;;  %v1011_v2 = vld [vmem:[%s1720_s4 + $0x40] ss:$0 sm:$0xff] }
  0x18   :  { %1004 = vmatmul.msk.f32.vlgmr.msrb.gmra.mxu3 %vm48_vm1, %v1002_v11  ;;  %876 = vmatpush.msrb.mxu0 %v851_v14  ;;  %v84_v50 = vadd.f32 %v1019_v46, %v83_v49 }
  0x1a   :  { %877 = vmatpush.msrb.mxu0 %v850_v15  ;;  %v1216_v51 = vsel %vm85_vm4, %v1019_v46, %v84_v50 }
  0x1c   :  { %996 = vmatmul.msk.f32.vlgmr.msra.gmra.mxu1 %vm48_vm1, %v994_v12  ;;  %878 = vmatpush.msrb.mxu0 %v849_v16 }
  0x1e   :  { %879 = vmatpush.msrb.mxu0 %v848_v17 }
  0x20   :  { %880 = vmatpush.msrb.mxu0 %v847_v18 }
  0x21   :  { %1006 = vmatmul.msk.f32.vlgmr.msrb.gmra.mxu0 %vm861_vm2, %v859_v19 }
  0x89   :  { %v73_v21 = vpop.f32.mrf.mxu1 }
  0x8a   :  { %v74_v22 = vadd.f32 %v1010_v20, %v73_v21 }
  0x8b   :  { %v475_v23 = vpop.f32.mrf.mxu0 }
  0x8c   :  { %v476_v24 = vadd.f32 %v1010_v20, %v475_v23  ;;  %v77_v25 = vsel %vm76_vm3, %v74_v22, 0.0 }
  0x8d   :  { %78 = vadd.xlane.f32.xlu0 %v77_v25 }
  0x8e   :  { %v478_v26 = vsel %vm76_vm3, %v476_v24, 0.0 }
  0x8f   :  { %479 = vadd.xlane.f32.xlu2 %v478_v26 }
  0x90   :  { %v279_v27 = vpop.f32.mrf.mxu2 }
  0x91   :  { %v280_v28 = vadd.f32 %v1010_v20, %v279_v27  ;;  %v181_v29 = vpop.f32.mrf.mxu1 }
  0x92   :  { %v182_v30 = vadd.f32 %v1010_v20, %v181_v29 }
  0x93   :  { %v282_v31 = vsel %vm76_vm3, %v280_v28, 0.0  ;;  %v377_v32 = vpop.f32.mrf.mxu3 }
  0x94   :  { %283 = vadd.xlane.f32.xlu1 %v282_v31  ;;  %v184_v33 = vsel %vm76_vm3, %v182_v30, 0.0  ;;  %v378_v34 = vadd.f32 %v1010_v20, %v377_v32 }
  0x95   :  { %185 = vadd.xlane.f32.xlu0 %v184_v33 }
  0x96   :  { %v380_v38 = vsel %vm76_vm3, %v378_v34, 0.0 }
  0x98   :  { %v671_v35 = vpop.f32.mrf.mxu2 }
  0x99   :  { %v573_v36 = vpop.f32.mrf.mxu1  ;;  %v672_v37 = vadd.f32 %v1010_v20, %v671_v35 }
  0x9a   :  { %v574_v39 = vadd.f32 %v1010_v20, %v573_v36 }
  0x9b   :  { %v674_v40 = vsel %vm76_vm3, %v672_v37, 0.0  ;;  %v769_v41 = vpop.f32.mrf.mxu3 }
  0x9c   :  { %381 = vadd.xlane.f32.xlu1 %v380_v38  ;;  %v576_v42 = vsel %vm76_vm3, %v574_v39, 0.0  ;;  %v770_v43 = vadd.f32 %v1010_v20, %v769_v41 }
  0x9d   :  { %577 = vadd.xlane.f32.xlu2 %v576_v42  ;;  %675 = vadd.xlane.f32.xlu0 %v674_v40 }
  0x9e   :  { %v772_v44 = vsel %vm76_vm3, %v770_v43, 0.0  ;;  %v882_v4 = vpop.f32.mrf.mxu0 }
  0x9f   :  { %v883_v12 = vadd.f32 %v1011_v2, %v882_v4 }
  0xa1   :  { %v885_v17 = vsel %vm76_vm3, %v883_v12, 0.0 }
  0xa4   :  { %773 = vadd.xlane.f32.xlu1 %v772_v44 }
 0x100   :  { %v79_v52 = vpop.xlane.xlu0 %78 }
 0x101   :  { %v87_v53 = vmul.f32 %v1216_v51, %v79_v52 }
 0x102   :  { %v480_v58 = vpop.xlane.xlu2 %479 }
 0x103   :  { %v1219_v54 = vsub.f32 %v74_v22, %v87_v53  ;;  %v481_v63 = vmul.f32 %v480_v58, %v1216_v51 }
 0x105   :  { %v89_v55 = vmul.f32 %v1219_v54, %v1219_v54  ;;  %v1239_v6 = vsub.f32 %v476_v24, %v481_v63 }
 0x107   :  { %v284_v56 = vpop.xlane.xlu1 %283  ;;  %v90_v57 = vsel %vm76_vm3, %v89_v55, 0.0  ;;  %v483_v16 = vmul.f32 %v1239_v6, %v1239_v6 }
 0x108   :  { %v285_v59 = vmul.f32 %v284_v56, %v1216_v51  ;;  %91 = vadd.xlane.f32.xlu2 %v90_v57  ;;  %v186_v60 = vpop.xlane.xlu0 %185 }
 0x109   :  { %v187_v61 = vmul.f32 %v186_v60, %v1216_v51  ;;  %v484_v23 = vsel %vm76_vm3, %v483_v16, 0.0 }
 0x10a   :  { %v1226_v62 = vsub.f32 %v280_v28, %v285_v59 }
 0x10b   :  { %v1229_v0 = vsub.f32 %v182_v30, %v187_v61 }
 0x10c   :  { %v287_v1 = vmul.f32 %v1226_v62, %v1226_v62 }
 0x10d   :  { %v189_v3 = vmul.f32 %v1229_v0, %v1229_v0 }
 0x10e   :  { %v288_v5 = vsel %vm76_vm3, %v287_v1, 0.0 }
 0x10f   :  { %289 = vadd.xlane.f32.xlu1 %v288_v5  ;;  %v382_v7 = vpop.xlane.xlu1 %381  ;;  %v190_v8 = vsel %vm76_vm3, %v189_v3, 0.0 }
 0x110   :  { %v383_v9 = vmul.f32 %v382_v7, %v1216_v51  ;;  %v578_v10 = vpop.xlane.xlu2 %577  ;;  %191 = vadd.xlane.f32.xlu0 %v190_v8  ;;  %v676_v11 = vpop.xlane.xlu0 %675 }
 0x111   :  { %v579_v14 = vmul.f32 %v578_v10, %v1216_v51  ;;  %v677_v15 = vmul.f32 %v676_v11, %v1216_v51 }
 0x112   :  { %v1243_v13 = vsub.f32 %v378_v34, %v383_v9 }
 0x113   :  { %v1252_v19 = vsub.f32 %v574_v39, %v579_v14  ;;  %v1255_v21 = vsub.f32 %v672_v37, %v677_v15  ;;  %v1297_v15 = vld [vmem:[%s1719_s3 + $0x15] ss:$0 sm:$0xff] }
 0x114   :  { %v385_v18 = vmul.f32 %v1243_v13, %v1243_v13 }
 0x115   :  { %v581_v26 = vmul.f32 %v1252_v19, %v1252_v19  ;;  %v679_v27 = vmul.f32 %v1255_v21, %v1255_v21 }
 0x116   :  { %v386_v20 = vsel %vm76_vm3, %v385_v18, 0.0 }
 0x117   :  { %886 = vadd.xlane.f32.xlu1 %v885_v17  ;;  %v774_v22 = vpop.xlane.xlu1 %773  ;;  %387 = vadd.xlane.f32.xlu2 %v386_v20  ;;  %v582_v30 = vsel %vm76_vm3, %v581_v26, 0.0  ;;  %v680_v31 = vsel %vm76_vm3, %v679_v27, 0.0 }
 0x118   :  { %v775_v24 = vmul.f32 %v774_v22, %v1216_v51  ;;  %485 = vadd.xlane.f32.xlu0 %v484_v23 }
 0x11a   :  { %v1259_v25 = vsub.f32 %v770_v43, %v775_v24 }
 0x11c   :  { %v777_v28 = vmul.f32 %v1259_v25, %v1259_v25 }
 0x11e   :  { %v778_v29 = vsel %vm76_vm3, %v777_v28, 0.0 }
 0x11f   :  { %779 = vadd.xlane.f32.xlu1 %v778_v29  ;;  %583 = vadd.xlane.f32.xlu2 %v582_v30 }
 0x120   :  { %681 = vadd.xlane.f32.xlu0 %v680_v31  ;;  %v1320_v31 = vld [vmem:[%s1719_s3 + $0x16] ss:$0 sm:$0xff] }
 0x17b   :  { %v92_v32 = vpop.xlane.xlu2 %91 }
 0x17c   :  { %v93_v33 = vmul.f32 %v92_v32, %v1216_v51 }
 0x17e   :  { %v94_v34 = vadd.f32 1e-05, %v93_v33 }
 0x180   :  { %1020 = vrsqrt.f32 %v94_v34  ;;  %vm101_vm6 = vweird.f32 %v94_v34 }
 0x182   :  { %v290_v35 = vpop.xlane.xlu1 %289 }
 0x183   :  { %v291_v36 = vmul.f32 %v290_v35, %v1216_v51  ;;  %v192_v37 = vpop.xlane.xlu0 %191 }
 0x184   :  { %v193_v38 = vmul.f32 %v192_v37, %v1216_v51 }
 0x185   :  { %v292_v39 = vadd.f32 1e-05, %v291_v36 }
 0x186   :  { %v1021_v40 = vpop.eup %1020  ;;  %v1273_v41 = vadd.f32 1e-05, %v193_v38 }
 0x187   :  { %v96_v42 = vmul.f32 %v1021_v40, %v94_v34  ;;  %1022 = vrsqrt.f32 %v292_v39  ;;  %vm102_vm5 = vweird.f32 %v1021_v40  ;;  %vm299_vm8 = vweird.f32 %v292_v39 }
 0x188   :  { %1024 = vrsqrt.f32 %v1273_v41  ;;  %vm103_vm7 = vmor %vm101_vm6, %vm102_vm5  ;;  %vm201_vm11 = vweird.f32 %v1273_v41 }
 0x189   :  { %v97_v43 = vmul.f32 %v1021_v40, %v96_v42 }
 0x18a   :  { %v887_v44 = vpop.xlane.xlu1 %886  ;;  %v388_v45 = vpop.xlane.xlu2 %387 }
 0x18b   :  { %v98_v46 = vmul.f32 0.5, %v97_v43  ;;  %v888_v47 = vmul.f32 %v887_v44, %v1216_v51  ;;  %v389_v48 = vmul.f32 %v388_v45, %v1216_v51  ;;  %v486_v49 = vpop.xlane.xlu0 %485 }
 0x18c   :  { %v487_v50 = vmul.f32 %v486_v49, %v1216_v51 }
 0x18d   :  { %v1023_v52 = vpop.eup %1022  ;;  %v99_v53 = vsub.f32 1.5, %v98_v46  ;;  %v1279_v55 = vsub.f32 %v883_v12, %v888_v47  ;;  %v1281_v56 = vadd.f32 1e-05, %v389_v48 }
 0x18e   :  { %v1025_v57 = vpop.eup %1024  ;;  %v294_v58 = vmul.f32 %v1023_v52, %v292_v39  ;;  %v1283_v59 = vadd.f32 1e-05, %v487_v50  ;;  %vm300_vm9 = vweird.f32 %v1023_v52 }
 0x18f   :  { %v100_v60 = vmul.f32 %v1021_v40, %v99_v53  ;;  %v196_v61 = vmul.f32 %v1025_v57, %v1273_v41  ;;  %1026 = vrsqrt.f32 %v1281_v56  ;;  %v890_v3 = vmul.f32 %v1279_v55, %v1279_v55  ;;  %vm301_vm12 = vmor %vm299_vm8, %vm300_vm9 }
 0x190   :  { %v295_v63 = vmul.f32 %v1023_v52, %v294_v58  ;;  %1028 = vrsqrt.f32 %v1283_v59  ;;  %vm202_vm10 = vweird.f32 %v1025_v57  ;;  %vm397_vm0 = vweird.f32 %v1281_v56 }
 0x191   :  { %v104_v1 = vsel %vm103_vm7, %v1021_v40, %v100_v60  ;;  %v197_v2 = vmul.f32 %v1025_v57, %v196_v61  ;;  %v891_v11 = vsel %vm76_vm3, %v890_v3, 0.0  ;;  %vm203_vm13 = vmor %vm201_vm11, %vm202_vm10  ;;  %vm495_vm2 = vweird.f32 %v1283_v59 }
 0x192   :  { %v105_v4 = vmul.f32 %v104_v1, %v1219_v54  ;;  %v296_v5 = vmul.f32 0.5, %v295_v63  ;;  %v780_v7 = vpop.xlane.xlu1 %779  ;;  %v584_v8 = vpop.xlane.xlu2 %583  ;;  %892 = vadd.xlane.f32.xlu2 %v891_v11 }
 0x193   :  { %v198_v9 = vmul.f32 0.5, %v197_v2  ;;  %v781_v10 = vmul.f32 %v780_v7, %v1216_v51  ;;  %v585_v12 = vmul.f32 %v584_v8, %v1216_v51  ;;  %v682_v14 = vpop.xlane.xlu0 %681 }
 0x194   :  { %v297_v16 = vsub.f32 1.5, %v296_v5  ;;  %v683_v54 = vmul.f32 %v682_v14, %v1216_v51  ;;  %v107_v30 = vmul.f32 %v1297_v15, %v105_v4 }
 0x195   :  { %v1300_v17 = vpop.eup %1026  ;;  %v199_v18 = vsub.f32 1.5, %v198_v9  ;;  %v1302_v20 = vadd.f32 1e-05, %v781_v10  ;;  %v1304_v22 = vadd.f32 1e-05, %v585_v12 }
 0x196   :  { %v1306_v23 = vpop.eup %1028  ;;  %v298_v24 = vmul.f32 %v1023_v52, %v297_v16  ;;  %v392_v26 = vmul.f32 %v1300_v17, %v1281_v56  ;;  %v1311_v27 = vadd.f32 1e-05, %v683_v54  ;;  %v109_v39 = vadd.f32 %v1320_v31, %v107_v30 }
 0x197   :  { %v200_v28 = vmul.f32 %v1025_v57, %v199_v18  ;;  %v490_v29 = vmul.f32 %v1306_v23, %v1283_v59  ;;  %1030 = vrsqrt.f32 %v1302_v20  ;;  %vm398_vm14 = vweird.f32 %v1300_v17 }
 0x198   :  { %v302_v32 = vsel %vm301_vm12, %v1023_v52, %v298_v24  ;;  %v393_v33 = vmul.f32 %v1300_v17, %v392_v26  ;;  %1032 = vrsqrt.f32 %v1304_v22  ;;  %v1333_v43 = vmul.f32 0.70710677, %v109_v39  ;;  %vm1362_vm1 = vmor %vm397_vm0, %vm398_vm14 }
 0x199   :  { %v303_v34 = vmul.f32 %v302_v32, %v1226_v62  ;;  %v204_v35 = vsel %vm203_vm13, %v1025_v57, %v200_v28  ;;  %v491_v36 = vmul.f32 %v1306_v23, %v490_v29  ;;  %1034 = vrsqrt.f32 %v1311_v27 }
 0x19a   :  { %v394_v37 = vmul.f32 0.5, %v393_v33  ;;  %v205_v38 = vmul.f32 %v204_v35, %v1229_v0  ;;  %v112_v0 = vand.u32 2147483647, %v1333_v43  ;;  %vm496_vm15 = vweird.f32 %v1306_v23 }
 0x19b   :  { %v304_v40 = vmul.f32 %v1297_v15, %v303_v34  ;;  %v492_v41 = vmul.f32 0.5, %v491_v36  ;;  %vm1371_vm4 = vmor %vm495_vm2, %vm496_vm15  ;;  %vm789_vm5 = vweird.f32 %v1302_v20  ;;  %vm593_vm6 = vweird.f32 %v1304_v22 }
 0x19c   :  { %v395_v62 = vsub.f32 1.5, %v394_v37  ;;  %v206_v48 = vmul.f32 %v1297_v15, %v205_v38  ;;  %v113_v60 = vmul.f32 0.3275911, %v112_v0  ;;  %v139_v56 = vsub.f32 0.0, %v112_v0 }
 0x19d   :  { %v1331_v42 = vpop.eup %1030  ;;  %v305_v47 = vadd.f32 %v1320_v31, %v304_v40  ;;  %v493_v50 = vsub.f32 1.5, %v492_v41  ;;  %vm691_vm9 = vweird.f32 %v1311_v27 }
 0x19e   :  { %v1335_v44 = vpop.eup %1032  ;;  %v784_v45 = vmul.f32 %v1331_v42, %v1302_v20  ;;  %v396_v61 = vmul.f32 %v1300_v17, %v395_v62  ;;  %v207_v2 = vadd.f32 %v1320_v31, %v206_v48  ;;  %v1358_v5 = vadd.f32 1.0, %v113_v60 }
 0x19f   :  { %v588_v46 = vmul.f32 %v1335_v44, %v1304_v22  ;;  %v1344_v49 = vpop.eup %1034  ;;  %v1353_v1 = vmul.f32 0.70710677, %v305_v47  ;;  %v494_v3 = vmul.f32 %v1306_v23, %v493_v50  ;;  %vm790_vm7 = vweird.f32 %v1331_v42 }
 0x1a0   :  { %v785_v52 = vmul.f32 %v1331_v42, %v784_v45  ;;  %v686_v57 = vmul.f32 %v1344_v49, %v1311_v27  ;;  %1036 = vrcp.f32 %v1358_v5  ;;  %v400_v11 = vsel %vm1362_vm1, %v1300_v17, %v396_v61  ;;  %vm1403_vm11 = vmor %vm789_vm5, %vm790_vm7 }
 0x1a1   :  { %v589_v53 = vmul.f32 %v1335_v44, %v588_v46  ;;  %v308_v7 = vand.u32 2147483647, %v1353_v1  ;;  %v1376_v14 = vmul.f32 0.70710677, %v207_v2  ;;  %v498_v59 = vsel %vm1371_vm4, %v1306_v23, %v494_v3 }
 0x1a2   :  { %v786_v58 = vmul.f32 0.5, %v785_v52  ;;  %v687_v63 = vmul.f32 %v1344_v49, %v686_v57  ;;  %vm594_vm8 = vweird.f32 %v1335_v44  ;;  %v1385_v17 = vmul.f32 0.5, %v109_v39 }
 0x1a3   :  { %v590_v4 = vmul.f32 0.5, %v589_v53  ;;  %v309_v54 = vmul.f32 0.3275911, %v308_v7  ;;  %v401_v18 = vmul.f32 %v400_v11, %v1243_v13  ;;  %v499_v23 = vmul.f32 %v498_v59, %v1239_v6  ;;  %vm1420_vm12 = vmor %vm593_vm6, %vm594_vm8 }
 0x1a4   :  { %v787_v9 = vsub.f32 1.5, %v786_v58  ;;  %v688_v10 = vmul.f32 0.5, %v687_v63  ;;  %v140_v29 = vmul.f32 %v139_v56, %v112_v0  ;;  %v1392_v30 = vmul.f32 0.5, %v305_v47 }
 0x1a5   :  { %v591_v16 = vsub.f32 1.5, %v590_v4  ;;  %v1389_v28 = vadd.f32 1.0, %v309_v54  ;;  %v210_v32 = vand.u32 2147483647, %v1376_v14  ;;  %vm692_vm10 = vweird.f32 %v1344_v49 }
 0x1a6   :  { %v788_v24 = vmul.f32 %v1331_v42, %v787_v9  ;;  %v689_v26 = vsub.f32 1.5, %v688_v10  ;;  %v1037_v33 = vpop.eup %1036  ;;  %v124_v35 = vand.u32 2147483647, %v1358_v5  ;;  %v126_v36 = vand.u32 2147483648, %v1358_v5  ;;  %vm1443_vm15 = vmor %vm691_vm9, %vm692_vm10 }
 0x1a7   :  { %v592_v34 = vmul.f32 %v1335_v44, %v591_v16  ;;  %1038 = vrcp.f32 %v1389_v28  ;;  %v116_v13 = vmul.f32 %v1037_v33, %v1358_v5  ;;  %v335_v37 = vsub.f32 0.0, %v308_v7 }
 0x1a8   :  { %v1409_v38 = vmul.f32 0.5, %v207_v2  ;;  %v792_v39 = vsel %vm1403_vm11, %v1331_v42, %v788_v24  ;;  %v690_v40 = vmul.f32 %v1344_v49, %v689_v26  ;;  %v211_v41 = vmul.f32 0.3275911, %v210_v32 }
 0x1a9   :  { %v402_v20 = vmul.f32 %v1297_v15, %v401_v18  ;;  %v117_v45 = vsub.f32 1.0, %v116_v13  ;;  %vm120_vm13 = vweird.f32 %v1358_v5  ;;  %v141_v46 = vmul.f32 1.442695, %v140_v29 }
 0x1aa   :  { %v500_v0 = vmul.f32 %v1297_v15, %v499_v23  ;;  %v596_v42 = vsel %vm1420_vm12, %v1335_v44, %v592_v34  ;;  %vm1429_vm14 = vcmp.eq.f32.partialorder %v124_v35, 8.507059e+37  ;;  %v1433_v48 = vadd.f32 1.0, %v211_v41 }
 0x1ab   :  { %v1436_v22 = vadd.f32 %v1320_v31, %v402_v20  ;;  %v793_v50 = vmul.f32 %v792_v39, %v1259_v25  ;;  %v118_v44 = vmul.f32 %v1037_v33, %v117_v45  ;;  %vm121_vm0 = vweird.f32 %v1037_v33 }
 0x1ac   :  { %v336_v53 = vmul.f32 %v335_v37, %v308_v7  ;;  %v694_v58 = vsel %vm1443_vm15, %v1344_v49, %v690_v40  ;;  %v127_v60 = vor.u32 1.1754944e-38, %v126_v36  ;;  %1040 = vrcp.f32 %v1433_v48  ;;  %vm122_vm1 = vmor %vm120_vm13, %vm121_vm0 }
 0x1ad   :  { %v1039_v57 = vpop.eup %1038  ;;  %v1452_v25 = vadd.f32 %v1320_v31, %v500_v0  ;;  %v597_v27 = vmul.f32 %v596_v42, %v1252_v19  ;;  %v119_v61 = vadd.f32 %v1037_v33, %v118_v44  ;;  %v320_v2 = vand.u32 2147483647, %v1389_v28 }
 0x1ae   :  { %v312_v63 = vmul.f32 %v1039_v57, %v1389_v28  ;;  %1042 = vpow2.f32 %v141_v46  ;;  %v322_v3 = vand.u32 2147483648, %v1389_v28  ;;  %v237_v49 = vsub.f32 0.0, %v210_v32 }
 0x1af   :  { %v1461_v4 = vmul.f32 0.70710677, %v1436_v22  ;;  %v1464_v7 = vmul.f32 %v694_v58, %v1255_v21  ;;  %v123_v8 = vsel %vm122_vm1, %v1037_v33, %v119_v61  ;;  %v337_v9 = vmul.f32 1.442695, %v336_v53 }
 0x1b0   :  { %v313_v19 = vsub.f32 1.0, %v312_v63  ;;  %v1468_v10 = vsel %vm1429_vm14, %v127_v60, %v123_v8  ;;  %vm316_vm2 = vweird.f32 %v1389_v28  ;;  %v1473_v11 = vmul.f32 0.70710677, %v1452_v25 }
 0x1b1   :  { %v406_v5 = vand.u32 2147483647, %v1461_v4  ;;  %v130_v12 = vmul.f32 1.0614054, %v1468_v10  ;;  %vm317_vm4 = vweird.f32 %v1039_v57  ;;  %vm1476_vm5 = vcmp.eq.f32.partialorder %v320_v2, 8.507059e+37 }
 0x1b2   :  { %v314_v56 = vmul.f32 %v1039_v57, %v313_v19  ;;  %v1041_v59 = vpop.eup %1040  ;;  %v323_v16 = vor.u32 1.1754944e-38, %v322_v3  ;;  %v238_v54 = vmul.f32 %v237_v49, %v210_v32  ;;  %v504_v24 = vand.u32 2147483647, %v1473_v11  ;;  %vm318_vm6 = vmor %vm316_vm2, %vm317_vm4 }
 0x1b3   :  { %v407_v18 = vmul.f32 0.3275911, %v406_v5  ;;  %v131_v26 = vadd.f32 -1.4531521, %v130_v12  ;;  %1044 = vpow2.f32 %v337_v9  ;;  %v214_v29 = vmul.f32 %v1041_v59, %v1433_v48 }
 0x1b4   :  { %v315_v23 = vadd.f32 %v1039_v57, %v314_v56  ;;  %v1482_v33 = vpop.eup %1042  ;;  %v222_v34 = vand.u32 2147483647, %v1433_v48  ;;  %v505_v6 = vmul.f32 0.3275911, %v504_v24  ;;  %v598_v32 = vmul.f32 %v1297_v15, %v597_v27 }
 0x1b5   :  { %v1487_v35 = vadd.f32 1.0, %v407_v18  ;;  %v132_v13 = vmul.f32 %v131_v26, %v1468_v10  ;;  %v215_v37 = vsub.f32 1.0, %v214_v29  ;;  %v224_v39 = vand.u32 2147483648, %v1433_v48 }
 0x1b6   :  { %v319_v36 = vsel %vm318_vm6, %v1039_v57, %v315_v23  ;;  %v239_v41 = vmul.f32 1.442695, %v238_v54  ;;  %v794_v28 = vmul.f32 %v1297_v15, %v793_v50  ;;  %vm219_vm7 = vweird.f32 %v1041_v59 }
 0x1b7   :  { %v1494_v40 = vsel %vm1476_vm5, %v323_v16, %v319_v36  ;;  %1046 = vrcp.f32 %v1487_v35  ;;  %v133_v20 = vadd.f32 1.4214138, %v132_v13  ;;  %v216_v45 = vmul.f32 %v1041_v59, %v215_v37 }
 0x1b8   :  { %v326_v62 = vmul.f32 1.0614054, %v1494_v40  ;;  %vm218_vm8 = vweird.f32 %v1433_v48  ;;  %vm1500_vm9 = vcmp.eq.f32.partialorder %v222_v34, 8.507059e+37  ;;  %v433_v0 = vsub.f32 0.0, %v406_v5 }
 0x1b9   :  { %v1504_v42 = vadd.f32 1.0, %v505_v6  ;;  %v1506_v47 = vpop.eup %1044  ;;  %v134_v52 = vmul.f32 %v133_v20, %v1468_v10  ;;  %v217_v50 = vadd.f32 %v1041_v59, %v216_v45  ;;  %v225_v53 = vor.u32 1.1754944e-38, %v224_v39  ;;  %vm220_vm10 = vmor %vm218_vm8, %vm219_vm7 }
 0x1ba   :  { %v327_v44 = vadd.f32 -1.4531521, %v326_v62  ;;  %1048 = vpow2.f32 %v239_v41  ;;  %v1510_v57 = vmul.f32 0.5, %v1436_v22  ;;  %v418_v48 = vand.u32 2147483647, %v1487_v35 }
 0x1bb   :  { %v1514_v58 = vadd.f32 %v1320_v31, %v598_v32  ;;  %v135_v60 = vadd.f32 -0.28449672, %v134_v52  ;;  %v221_v61 = vsel %vm220_vm10, %v1041_v59, %v217_v50  ;;  %1050 = vrcp.f32 %v1504_v42 }
 0x1bc   :  { %v328_v27 = vmul.f32 %v327_v44, %v1494_v40  ;;  %v1520_v2 = vsel %vm1500_vm9, %v225_v53, %v221_v61  ;;  %v434_v3 = vmul.f32 %v433_v0, %v406_v5  ;;  %v531_v49 = vsub.f32 0.0, %v504_v24 }
 0x1bd   :  { %v1047_v63 = vpop.eup %1046  ;;  %v1523_v22 = vadd.f32 %v1320_v31, %v794_v28  ;;  %v136_v8 = vmul.f32 %v135_v60, %v1468_v10  ;;  %v228_v9 = vmul.f32 1.0614054, %v1520_v2  ;;  %vm414_vm11 = vweird.f32 %v1487_v35 }
 0x1be   :  { %v329_v19 = vadd.f32 1.4214138, %v328_v27  ;;  %v410_v12 = vmul.f32 %v1047_v63, %v1487_v35  ;;  %vm1529_vm12 = vcmp.eq.f32.partialorder %v418_v48, 8.507059e+37  ;;  %v420_v21 = vand.u32 2147483648, %v1487_v35 }
 0x1bf   :  { %v1535_v5 = vmul.f32 0.70710677, %v1514_v58  ;;  %v137_v59 = vadd.f32 0.2548296, %v136_v8  ;;  %v229_v54 = vadd.f32 -1.4531521, %v228_v9  ;;  %vm415_vm14 = vweird.f32 %v1047_v63 }
 0x1c0   :  { %v330_v16 = vmul.f32 %v329_v19, %v1494_v40  ;;  %v411_v18 = vsub.f32 1.0, %v410_v12  ;;  %v1538_v26 = vpop.eup %1048  ;;  %vm145_vm13 = vcmp.lt.f32.partialorder %v1333_v43, 0.0  ;;  %v435_v23 = vmul.f32 1.442695, %v434_v3  ;;  %vm416_vm15 = vmor %vm414_vm11, %vm415_vm14 }
 0x1c1   :  { %v1541_v29 = vmul.f32 %v531_v49, %v504_v24  ;;  %v1544_v34 = vand.u32 2147483647, %v1535_v5  ;;  %v1051_v6 = vpop.eup %1050  ;;  %v138_v32 = vmul.f32 %v137_v59, %v1468_v10  ;;  %v230_v36 = vmul.f32 %v229_v54, %v1520_v2  ;;  %v1582_v59 = vld [vmem:[%s1719_s3 + $0x17] ss:$0 sm:$0xff] }
 0x1c2   :  { %v331_v13 = vadd.f32 -0.28449672, %v330_v16  ;;  %v412_v37 = vmul.f32 %v1047_v63, %v411_v18  ;;  %v421_v39 = vor.u32 1.1754944e-38, %v420_v21  ;;  %v508_v41 = vmul.f32 %v1051_v6, %v1504_v42 }
 0x1c3   :  { %v516_v28 = vand.u32 2147483647, %v1504_v42  ;;  %v603_v20 = vmul.f32 0.3275911, %v1544_v34  ;;  %v143_v24 = vmul.f32 %v1482_v33, %v138_v32  ;;  %v231_v45 = vadd.f32 1.4214138, %v230_v36 }
 0x1c4   :  { %v332_v62 = vmul.f32 %v331_v13, %v1494_v40  ;;  %v413_v46 = vadd.f32 %v1047_v63, %v412_v37  ;;  %v509_v10 = vsub.f32 1.0, %v508_v41  ;;  %v518_v0 = vand.u32 2147483648, %v1504_v42 }
 0x1c5   :  { %v1557_v52 = vadd.f32 1.0, %v603_v20  ;;  %v1560_v44 = vmul.f32 0.70710677, %v1523_v22  ;;  %v144_v50 = vsub.f32 1.0, %v143_v24  ;;  %v232_v33 = vmul.f32 %v231_v45, %v1520_v2 }
 0x1c6   :  { %v333_v53 = vadd.f32 0.2548296, %v332_v62  ;;  %v417_v48 = vsel %vm416_vm15, %v1047_v63, %v413_v46  ;;  %vm341_vm0 = vcmp.lt.f32.partialorder %v1353_v1, 0.0  ;;  %v510_v35 = vmul.f32 %v1051_v6, %v509_v10 }
 0x1c7   :  { %v1566_v60 = vsel %vm1529_vm12, %v421_v39, %v417_v48  ;;  %vm513_vm1 = vweird.f32 %v1051_v6  ;;  %1052 = vrcp.f32 %v1557_v52  ;;  %v146_v27 = vsub.f32 0.0, %v144_v50 }
 0x1c8   :  { %v334_v61 = vmul.f32 %v333_v53, %v1494_v40  ;;  %v233_v3 = vadd.f32 -0.28449672, %v232_v33  ;;  %v424_v49 = vmul.f32 1.0614054, %v1566_v60  ;;  %v511_v8 = vadd.f32 %v1051_v6, %v510_v35 }
 0x1c9   :  { %vm512_vm2 = vweird.f32 %v1504_v42  ;;  %v519_v63 = vor.u32 1.1754944e-38, %v518_v0  ;;  %v1573_v19 = vand.u32 2147483647, %v1560_v44  ;;  %v147_v9 = vsel %vm145_vm13, %v146_v27, %v144_v50 }
 0x1ca   :  { %v339_v12 = vmul.f32 %v1506_v47, %v334_v61  ;;  %v234_v56 = vmul.f32 %v233_v3, %v1520_v2  ;;  %v425_v21 = vadd.f32 -1.4531521, %v424_v49  ;;  %vm514_vm4 = vmor %vm512_vm2, %vm513_vm1  ;;  %v148_v40 = vadd.f32 1.0, %v147_v9 }
 0x1cb   :  { %1054 = vpow2.f32 %v435_v23  ;;  %v515_v42 = vsel %vm514_vm4, %v1051_v6, %v511_v8  ;;  %vm517_vm5 = vcmp.eq.f32.partialorder %v516_v28, 8.507059e+37  ;;  %vm243_vm6 = vcmp.lt.f32.partialorder %v1376_v14, 0.0 }
 0x1cc   :  { %v340_v16 = vsub.f32 1.0, %v339_v12  ;;  %v235_v54 = vadd.f32 0.2548296, %v234_v56  ;;  %v426_v43 = vmul.f32 %v425_v21, %v1566_v60  ;;  %v1585_v18 = vsel %vm517_vm5, %v519_v63, %v515_v42 }
 0x1cd   :  { %v1053_v47 = vpop.eup %1052  ;;  %v149_v32 = vmul.f32 %v148_v40, %v1385_v17  ;;  %v522_v13 = vmul.f32 1.0614054, %v1585_v18  ;;  %v614_v36 = vand.u32 2147483647, %v1557_v52  ;;  %v799_v37 = vmul.f32 0.3275911, %v1573_v19 }
 0x1ce   :  { %v342_v23 = vsub.f32 0.0, %v340_v16  ;;  %v236_v6 = vmul.f32 %v235_v54, %v1520_v2  ;;  %v427_v39 = vadd.f32 1.4214138, %v426_v43  ;;  %v606_v41 = vmul.f32 %v1053_v47, %v1557_v52 }
 0x1cf   :  { %v151_v28 = vmul.f32 %v1582_v59, %v149_v32  ;;  %v523_v20 = vadd.f32 -1.4531521, %v522_v13  ;;  %v616_v24 = vand.u32 2147483648, %v1557_v52  ;;  %v1596_v17 = vadd.f32 1.0, %v799_v37 }
 0x1d0   :  { %v343_v62 = vsel %vm341_vm0, %v342_v23, %v340_v16  ;;  %v241_v45 = vmul.f32 %v1538_v26, %v236_v6  ;;  %v428_v46 = vmul.f32 %v427_v39, %v1566_v60  ;;  %v607_v10 = vsub.f32 1.0, %v606_v41 }
 0x1d1   :  { %v1055_v0 = vpop.eup %1054  ;;  %v152_v2 = vsel %vm76_vm3, %v151_v28, 0.0  ;;  %v344_v50 = vadd.f32 1.0, %v343_v62  ;;  %v524_v53 = vmul.f32 %v523_v20, %v1585_v18  ;;  %1056 = vrcp.f32 %v1596_v17 }
 0x1d2   :  { %153 = vadd.xlane.f32.xlu0 %v152_v2  ;;  %v242_v33 = vsub.f32 1.0, %v241_v45  ;;  %v429_v48 = vadd.f32 -0.28449672, %v428_v46  ;;  %v608_v35 = vmul.f32 %v1053_v47, %v607_v10  ;;  %vm611_vm7 = vweird.f32 %v1053_v47 }
 0x1d3   :  { %v345_v1 = vmul.f32 %v344_v50, %v1392_v30  ;;  %v525_v27 = vadd.f32 1.4214138, %v524_v53  ;;  %v533_v26 = vmul.f32 1.442695, %v1541_v29  ;;  %v696_v61 = vmul.f32 %v1297_v15, %v1464_v7 }
 0x1d4   :  { %v244_v3 = vsub.f32 0.0, %v242_v33  ;;  %v430_v49 = vmul.f32 %v429_v48, %v1566_v60  ;;  %v609_v8 = vadd.f32 %v1053_v47, %v608_v35  ;;  %vm610_vm8 = vweird.f32 %v1557_v52 }
 0x1d5   :  { %v346_v63 = vmul.f32 %v1582_v59, %v345_v1  ;;  %v526_v9 = vmul.f32 %v525_v27, %v1585_v18  ;;  %vm612_vm9 = vmor %vm610_vm8, %vm611_vm7  ;;  %v617_v12 = vor.u32 1.1754944e-38, %v616_v24  ;;  %v629_v30 = vsub.f32 0.0, %v1544_v34 }
 0x1d6   :  { %v245_v29 = vsel %vm243_vm6, %v244_v3, %v242_v33  ;;  %v431_v56 = vadd.f32 0.2548296, %v430_v49  ;;  %v613_v21 = vsel %vm612_vm9, %v1053_v47, %v609_v8  ;;  %vm615_vm10 = vcmp.eq.f32.partialorder %v614_v36, 8.507059e+37 }
 0x1d7   :  { %v1057_v15 = vpop.eup %1056  ;;  %v347_v7 = vsel %vm76_vm3, %v346_v63, 0.0  ;;  %v246_v40 = vadd.f32 1.0, %v245_v29  ;;  %v527_v42 = vadd.f32 -0.28449672, %v526_v9  ;;  %v1617_v52 = vsel %vm615_vm10, %v617_v12, %v613_v21 }
 0x1d8   :  { %348 = vadd.xlane.f32.xlu2 %v347_v7  ;;  %v432_v16 = vmul.f32 %v431_v56, %v1566_v60  ;;  %1058 = vpow2.f32 %v533_v26  ;;  %v620_v54 = vmul.f32 1.0614054, %v1617_v52  ;;  %v802_v43 = vmul.f32 %v1057_v15, %v1596_v17 }
 0x1d9   :  { %v247_v14 = vmul.f32 %v246_v40, %v1409_v38  ;;  %vm439_vm11 = vcmp.lt.f32.partialorder %v1461_v4, 0.0  ;;  %v528_v47 = vmul.f32 %v527_v42, %v1585_v18  ;;  %v630_v32 = vmul.f32 %v629_v30, %v1544_v34 }
 0x1da   :  { %v437_v13 = vmul.f32 %v1055_v0, %v432_v16  ;;  %v621_v36 = vadd.f32 -1.4531521, %v620_v54  ;;  %v803_v37 = vsub.f32 1.0, %v802_v43  ;;  %v1627_v23 = vadd.f32 %v1320_v31, %v696_v61 }
 0x1db   :  { %v248_v60 = vmul.f32 %v1582_v59, %v247_v14  ;;  %v529_v6 = vadd.f32 0.2548296, %v528_v47  ;;  %v810_v39 = vand.u32 2147483647, %v1596_v17  ;;  %v812_v41 = vand.u32 2147483648, %v1596_v17 }
 0x1dc   :  { %v438_v38 = vsub.f32 1.0, %v437_v13  ;;  %v622_v28 = vmul.f32 %v621_v36, %v1617_v52  ;;  %v804_v20 = vmul.f32 %v1057_v15, %v803_v37  ;;  %vm807_vm12 = vweird.f32 %v1057_v15 }
 0x1dd   :  { %v249_v34 = vsel %vm76_vm3, %v248_v60, 0.0  ;;  %v530_v24 = vmul.f32 %v529_v6, %v1585_v18  ;;  %v631_v62 = vmul.f32 1.442695, %v630_v32  ;;  %v1636_v31 = vmul.f32 0.70710677, %v1627_v23 }
 0x1de   :  { %v1059_v45 = vpop.eup %1058  ;;  %250 = vadd.xlane.f32.xlu1 %v249_v34  ;;  %v440_v46 = vsub.f32 0.0, %v438_v38  ;;  %v623_v10 = vadd.f32 1.4214138, %v622_v28  ;;  %v805_v0 = vadd.f32 %v1057_v15, %v804_v20  ;;  %vm806_vm13 = vweird.f32 %v1596_v17 }
 0x1df   :  { %v535_v2 = vmul.f32 %v1059_v45, %v530_v24  ;;  %vm808_vm14 = vmor %vm806_vm13, %vm807_vm12  ;;  %v813_v50 = vor.u32 1.1754944e-38, %v812_v41  ;;  %v825_v53 = vsub.f32 0.0, %v1573_v19  ;;  %v1641_v33 = vand.u32 2147483647, %v1636_v31 }
 0x1e0   :  { %v441_v18 = vsel %vm439_vm11, %v440_v46, %v438_v38  ;;  %v624_v48 = vmul.f32 %v623_v10, %v1617_v52  ;;  %v809_v35 = vsel %vm808_vm14, %v1057_v15, %v805_v0  ;;  %vm811_vm15 = vcmp.eq.f32.partialorder %v810_v39, 8.507059e+37 }
 0x1e1   :  { %v442_v1 = vadd.f32 1.0, %v441_v18  ;;  %v536_v27 = vsub.f32 1.0, %v535_v2  ;;  %v814_v26 = vsel %vm811_vm15, %v813_v50, %v809_v35  ;;  %v701_v17 = vmul.f32 0.3275911, %v1641_v33 }
 0x1e2   :  { %v625_v61 = vadd.f32 -0.28449672, %v624_v48  ;;  %v816_v3 = vmul.f32 1.0614054, %v814_v26  ;;  %1060 = vpow2.f32 %v631_v62  ;;  %vm537_vm0 = vcmp.lt.f32.partialorder %v1473_v11, 0.0 }
 0x1e3   :  { %v443_v49 = vmul.f32 %v442_v1, %v1510_v57  ;;  %v538_v8 = vsub.f32 0.0, %v536_v27  ;;  %v702_v63 = vadd.f32 1.0, %v701_v17  ;;  %v826_v29 = vmul.f32 %v825_v53, %v1573_v19 }
 0x1e4   :  { %v626_v4 = vmul.f32 %v625_v61, %v1617_v52  ;;  %v817_v9 = vadd.f32 -1.4531521, %v816_v3  ;;  %v502_v56 = vmul.f32 0.5, %v1452_v25  ;;  %vm635_vm1 = vcmp.lt.f32.partialorder %v1535_v5, 0.0 }
 0x1e5   :  { %v444_v12 = vmul.f32 %v1582_v59, %v443_v49  ;;  %v539_v30 = vsel %vm537_vm0, %v538_v8, %v536_v27  ;;  %1062 = vrcp.f32 %v702_v63  ;;  %v827_v54 = vmul.f32 1.442695, %v826_v29 }
 0x1e6   :  { %v540_v21 = vadd.f32 1.0, %v539_v30  ;;  %v627_v15 = vadd.f32 0.2548296, %v626_v4  ;;  %v818_v7 = vmul.f32 %v817_v9, %v814_v26  ;;  %v714_v39 = vand.u32 2147483648, %v702_v63 }
 0x1e7   :  { %v445_v57 = vsel %vm76_vm3, %v444_v12, 0.0  ;;  %1064 = vpow2.f32 %v827_v54  ;;  %v600_v20 = vmul.f32 0.5, %v1514_v58  ;;  %vm708_vm4 = vweird.f32 %v702_v63 }
 0x1e8   :  { %446 = vadd.xlane.f32.xlu0 %v445_v57  ;;  %v541_v40 = vmul.f32 %v540_v21, %v502_v56  ;;  %v628_v11 = vmul.f32 %v627_v15, %v1617_v52  ;;  %v819_v42 = vadd.f32 1.4214138, %v818_v7  ;;  %v1061_v16 = vpop.eup %1060  ;;  %v712_v52 = vand.u32 2147483647, %v702_v63 }
 0x1e9   :  { %v715_v10 = vor.u32 1.1754944e-38, %v714_v39  ;;  %v727_v53 = vsub.f32 0.0, %v1641_v33  ;;  %vm831_vm7 = vcmp.lt.f32.partialorder %v1560_v44, 0.0  ;;  %v796_v61 = vmul.f32 0.5, %v1523_v22 }
 0x1ea   :  { %v542_v43 = vmul.f32 %v1582_v59, %v541_v40  ;;  %v633_v14 = vmul.f32 %v1061_v16, %v628_v11  ;;  %v820_v47 = vmul.f32 %v819_v42, %v814_v26  ;;  %vm713_vm6 = vcmp.eq.f32.partialorder %v712_v52, 8.507059e+37 }
 0x1eb   :  { %v1063_v19 = vpop.eup %1062  ;;  %v728_v27 = vmul.f32 %v727_v53, %v1641_v33  ;;  %vm733_vm8 = vcmp.lt.f32.partialorder %v1636_v31, 0.0  ;;  %v698_v16 = vmul.f32 0.5, %v1627_v23  ;;  %v1015_v23 = vld [vmem:[%s1720_s4 + $0x41] ss:$0 sm:$0xff] }
 0x1ec   :  { %v543_v32 = vsel %vm76_vm3, %v542_v43, 0.0  ;;  %v634_v25 = vsub.f32 1.0, %v633_v14  ;;  %v821_v13 = vadd.f32 -0.28449672, %v820_v47  ;;  %v704_v36 = vmul.f32 %v1063_v19, %v702_v63 }
 0x1ed   :  { %544 = vadd.xlane.f32.xlu1 %v543_v32  ;;  %vm709_vm2 = vweird.f32 %v1063_v19  ;;  %v1065_v45 = vpop.eup %1064  ;;  %v729_v63 = vmul.f32 1.442695, %v728_v27 }
 0x1ee   :  { %v636_v37 = vsub.f32 0.0, %v634_v25  ;;  %v822_v60 = vmul.f32 %v821_v13, %v814_v26  ;;  %v705_v6 = vsub.f32 1.0, %v704_v36  ;;  %vm710_vm5 = vmor %vm708_vm4, %vm709_vm2  ;;  %vm967_vm2 = vcmask 19472  }
 0x1ef   :  { %1066 = vpow2.f32 %v729_v63 }
 0x1f0   :  { %v637_v41 = vsel %vm635_vm1, %v636_v37, %v634_v25  ;;  %v823_v38 = vadd.f32 0.2548296, %v822_v60  ;;  %v706_v28 = vmul.f32 %v1063_v19, %v705_v6  ;;  %vm961_vm1 = vcmask 11272  }
 0x1f1   :  { %v638_v34 = vadd.f32 1.0, %v637_v41 }
 0x1f2   :  { %v824_v24 = vmul.f32 %v823_v38, %v814_v26  ;;  %v707_v62 = vadd.f32 %v1063_v19, %v706_v28 }
 0x1f3   :  { %v639_v46 = vmul.f32 %v638_v34, %v600_v20 }
 0x1f4   :  { %v829_v0 = vmul.f32 %v1065_v45, %v824_v24  ;;  %v711_v2 = vsel %vm710_vm5, %v1063_v19, %v707_v62 }
 0x1f5   :  { %v640_v5 = vmul.f32 %v1582_v59, %v639_v46  ;;  %v716_v50 = vsel %vm713_vm6, %v715_v10, %v711_v2  ;;  %v1067_v22 = vpop.eup %1066 }
 0x1f6   :  { %v830_v18 = vsub.f32 1.0, %v829_v0  ;;  %v718_v48 = vmul.f32 1.0614054, %v716_v50 }
 0x1f7   :  { %v641_v58 = vsel %vm76_vm3, %v640_v5, 0.0 }
 0x1f8   :  { %642 = vadd.xlane.f32.xlu2 %v641_v58  ;;  %v832_v35 = vsub.f32 0.0, %v830_v18  ;;  %v719_v1 = vadd.f32 -1.4531521, %v718_v48 }
 0x1fa   :  { %v833_v26 = vsel %vm831_vm7, %v832_v35, %v830_v18  ;;  %v720_v17 = vmul.f32 %v719_v1, %v716_v50 }
 0x1fb   :  { %v834_v3 = vadd.f32 1.0, %v833_v26 }
 0x1fc   :  { %v721_v49 = vadd.f32 1.4214138, %v720_v17 }
 0x1fd   :  { %v835_v8 = vmul.f32 %v834_v3, %v796_v61 }
 0x1fe   :  { %v722_v4 = vmul.f32 %v721_v49, %v716_v50 }
 0x1ff   :  { %v836_v9 = vmul.f32 %v1582_v59, %v835_v8 }
 0x200   :  { %v723_v12 = vadd.f32 -0.28449672, %v722_v4 }
 0x201   :  { %v837_v30 = vsel %vm76_vm3, %v836_v9, 0.0  ;;  %v1017_v9 = vld [vmem:[%s1720_s4 + $0x43] ss:$0 sm:$0xff] }
 0x202   :  { %838 = vadd.xlane.f32.xlu1 %v837_v30  ;;  %v724_v29 = vmul.f32 %v723_v12, %v716_v50 }
 0x204   :  { %v725_v56 = vadd.f32 0.2548296, %v724_v29 }
 0x205   :  { %v893_v44 = vpop.xlane.xlu2 %892 }
 0x206   :  { %v894_v33 = vmul.f32 %v893_v44, %v1216_v51  ;;  %v726_v15 = vmul.f32 %v725_v56, %v716_v50  ;;  %v155_v56 = vstv %s974_s28 }
 0x208   :  { %v895_v21 = vadd.f32 1e-05, %v894_v33  ;;  %v731_v7 = vmul.f32 %v1067_v22, %v726_v15  ;;  %v981_v22 = vld [vmem:[%s1717_s1 + $0x4] sm:$0xf] }
 0x20a   :  { %1068 = vrsqrt.f32 %v895_v21  ;;  %v732_v57 = vsub.f32 1.0, %v731_v7  ;;  %vm902_vm10 = vweird.f32 %v895_v21 }
 0x20c   :  { %v734_v40 = vsub.f32 0.0, %v732_v57 }
 0x20e   :  { %v735_v42 = vsel %vm733_vm8, %v734_v40, %v732_v57  ;;  %v157_v57 = vld [vmem:[%s1717_s1] sm:$0xf] }
 0x20f   :  { %v736_v54 = vadd.f32 1.0, %v735_v42 }
 0x210   :  { %v1069_v11 = vpop.eup %1068 }
 0x211   :  { %v737_v43 = vmul.f32 %v736_v54, %v698_v16  ;;  %v897_v14 = vmul.f32 %v1069_v11, %v895_v21  ;;  %vm903_vm9 = vweird.f32 %v1069_v11 }
 0x212   :  { %vm904_vm11 = vmor %vm902_vm10, %vm903_vm9 }
 0x213   :  { %v738_v47 = vmul.f32 %v1582_v59, %v737_v43  ;;  %v898_v19 = vmul.f32 %v1069_v11, %v897_v14  ;;  %v1016_v59 = vld [vmem:[%s1720_s4 + $0x42] ss:$0 sm:$0xff]  ;;  %v985_v43 = vld [vmem:[%s1717_s1 + $0x8] sm:$0xf]  ;;  %v989_v14 = vld [vmem:[%s1717_s1 + $0xc] sm:$0xf] }
 0x215   :  { %v739_v51 = vsel %vm76_vm3, %v738_v47, 0.0  ;;  %v899_v32 = vmul.f32 0.5, %v898_v19 }
 0x216   :  { %740 = vadd.xlane.f32.xlu0 %v739_v51 }
 0x217   :  { %v900_v25 = vsub.f32 1.5, %v899_v32 }
 0x219   :  { %v901_v13 = vmul.f32 %v1069_v11, %v900_v25 }
 0x21b   :  { %v905_v31 = vsel %vm904_vm11, %v1069_v11, %v901_v13 }
 0x21c   :  { %v906_v36 = vmul.f32 %v905_v31, %v1279_v55  ;;  %v993_v31 = vld [vmem:[%s1717_s1 + $0x10] sm:$0xf] }
 0x21e   :  { %v908_v37 = vmul.f32 %v1015_v23, %v906_v36 }
 0x220   :  { %v910_v60 = vadd.f32 %v1016_v59, %v908_v37  ;;  %v997_v37 = vld [vmem:[%s1717_s1 + $0x14] sm:$0xf] }
 0x222   :  { %v912_v6 = vmul.f32 0.70710677, %v910_v60  ;;  %v911_v63 = vmul.f32 0.5, %v910_v60 }
 0x224   :  { %v913_v52 = vand.u32 2147483647, %v912_v6  ;;  %vm946_vm0 = vcmp.lt.f32.partialorder %v912_v6, 0.0 }
 0x226   :  { %v914_v39 = vmul.f32 0.3275911, %v913_v52  ;;  %v940_v0 = vsub.f32 0.0, %v913_v52 }
 0x228   :  { %v915_v41 = vadd.f32 1.0, %v914_v39  ;;  %v941_v50 = vmul.f32 %v940_v0, %v913_v52 }
 0x22a   :  { %1070 = vrcp.f32 %v915_v41  ;;  %v927_v34 = vand.u32 2147483648, %v915_v41  ;;  %v925_v24 = vand.u32 2147483647, %v915_v41  ;;  %vm921_vm13 = vweird.f32 %v915_v41 }
 0x22b   :  { %v942_v48 = vmul.f32 1.442695, %v941_v50 }
 0x22c   :  { %v928_v45 = vor.u32 1.1754944e-38, %v927_v34  ;;  %vm926_vm15 = vcmp.eq.f32.partialorder %v925_v24, 8.507059e+37 }
 0x22d   :  { %1072 = vpow2.f32 %v942_v48 }
 0x230   :  { %v1071_v38 = vpop.eup %1070 }
 0x231   :  { %v917_v28 = vmul.f32 %v1071_v38, %v915_v41  ;;  %vm922_vm12 = vweird.f32 %v1071_v38  ;;  %v1001_v41 = vld [vmem:[%s1717_s1 + $0x18] sm:$0xf] }
 0x232   :  { %vm923_vm14 = vmor %vm921_vm13, %vm922_vm12 }
 0x233   :  { %v918_v20 = vsub.f32 1.0, %v917_v28  ;;  %v1073_v17 = vpop.eup %1072 }
 0x235   :  { %v919_v55 = vmul.f32 %v1071_v38, %v918_v20 }
 0x237   :  { %v920_v62 = vadd.f32 %v1071_v38, %v919_v55  ;;  %v1005_v55 = vld [vmem:[%s1717_s1 + $0x1c] sm:$0xf] }
 0x239   :  { %v924_v46 = vsel %vm923_vm14, %v1071_v38, %v920_v62 }
 0x23a   :  { %v929_v10 = vsel %vm926_vm15, %v928_v45, %v924_v46  ;;  %v845_v46 = vstv %s36_s14 }
 0x23b   :  { %v931_v2 = vmul.f32 1.0614054, %v929_v10 }
 0x23d   :  { %v932_v5 = vadd.f32 -1.4531521, %v931_v2  ;;  %v956_v2 = vstv %s975_s19 }
 0x23f   :  { %v933_v53 = vmul.f32 %v932_v5, %v929_v10 }
 0x241   :  { %v934_v18 = vadd.f32 1.4214138, %v933_v53 }
 0x243   :  { %v935_v58 = vmul.f32 %v934_v18, %v929_v10 }
 0x245   :  { %v936_v35 = vadd.f32 -0.28449672, %v935_v58  ;;  %v154_v44 = vpop.xlane.xlu0 %153 }
 0x246   :  { %v156_v7 = vadd.f32 %v155_v56, %v154_v44 }
 0x247   :  { %v937_v1 = vmul.f32 %v936_v35, %v929_v10 }
 0x248   :  { %v158_v42 = vmul.f32 %v157_v57, %v156_v7 }
 0x249   :  { %v938_v27 = vadd.f32 0.2548296, %v937_v1 }
 0x24b   :  { %v939_v26 = vmul.f32 %v938_v27, %v929_v10  ;;  %v349_v15 = vpop.xlane.xlu2 %348 }
 0x24c   :  { %v350_v16 = vadd.f32 %v349_v15, %v155_v56 }
 0x24d   :  { %v944_v61 = vmul.f32 %v1073_v17, %v939_v26 }
 0x24e   :  { %v353_v32 = vmul.f32 %v985_v43, %v350_v16 }
 0x24f   :  { %v945_v3 = vsub.f32 1.0, %v944_v61 }
 0x251   :  { %v947_v49 = vsub.f32 0.0, %v945_v3  ;;  %v251_v33 = vpop.xlane.xlu1 %250 }
 0x252   :  { %v252_v21 = vadd.f32 %v251_v33, %v155_v56 }
 0x253   :  { %v948_v8 = vsel %vm946_vm0, %v947_v49, %v945_v3 }
 0x254   :  { %v949_v4 = vadd.f32 1.0, %v948_v8  ;;  %v255_v11 = vmul.f32 %v981_v22, %v252_v21 }
 0x256   :  { %v950_v12 = vmul.f32 %v949_v4, %v911_v63  ;;  %v256_v51 = vadd.f32 %v255_v11, %v158_v42 }
 0x258   :  { %v952_v30 = vmul.f32 %v1017_v9, %v950_v12  ;;  %v354_v36 = vadd.f32 %v353_v32, %v256_v51 }
 0x25a   :  { %v953_v29 = vsel %vm76_vm3, %v952_v30, 0.0  ;;  %vm959_vm3 = vcmask 3072  }
 0x25b   :  { %954 = vadd.xlane.f32.xlu2 %v953_v29  ;;  %v447_v40 = vpop.xlane.xlu0 %446 }
 0x25c   :  { %v448_v54 = vadd.f32 %v447_v40, %v155_v56 }
 0x25e   :  { %v451_v25 = vmul.f32 %v989_v14, %v448_v54 }
 0x260   :  { %v545_v47 = vpop.xlane.xlu1 %544  ;;  %v452_v59 = vadd.f32 %v451_v25, %v354_v36 }
 0x261   :  { %v546_v13 = vadd.f32 %v545_v47, %v155_v56 }
 0x263   :  { %v549_v60 = vmul.f32 %v993_v31, %v546_v13 }
 0x265   :  { %v550_v39 = vadd.f32 %v549_v60, %v452_v59 }
 0x26b   :  { %v643_v19 = vpop.xlane.xlu2 %642 }
 0x26c   :  { %v644_v23 = vadd.f32 %v643_v19, %v155_v56 }
 0x26e   :  { %v647_v6 = vmul.f32 %v997_v37, %v644_v23 }
 0x270   :  { %v648_v28 = vadd.f32 %v647_v6, %v550_v39 }
 0x275   :  { %v839_v52 = vpop.xlane.xlu1 %838 }
 0x276   :  { %v840_v20 = vadd.f32 %v839_v52, %v155_v56 }
 0x278   :  { %v843_v62 = vmul.f32 %v1005_v55, %v840_v20 }
 0x289   :  { %v741_v38 = vpop.xlane.xlu0 %740 }
 0x28a   :  { %v742_v34 = vadd.f32 %v741_v38, %v155_v56 }
 0x28c   :  { %v745_v24 = vmul.f32 %v1001_v41, %v742_v34 }
 0x28e   :  { %v746_v45 = vadd.f32 %v745_v24, %v648_v28 }
 0x290   :  { %v844_v10 = vadd.f32 %v843_v62, %v746_v45 }
 0x292   :  { %v846_v0 = vmul.f32 %v845_v46, %v844_v10 }
 0x294   :  { %964 = vrot.lane.b32.xlu0 %v846_v0, %s1090_s18 }
 0x2ce   :  { %v955_v5 = vpop.xlane.xlu2 %954 }
 0x2cf   :  { %v957_v50 = vadd.f32 %v956_v2, %v955_v5 }
 0x2d1   :  { %v958_v53 = vadd.f32 %v957_v50, %v846_v0 }
 0x2d3   :  { %960 = vst.msk [vmem:[%s1722_s6] sm:$0xf] %vm959_vm3, %v958_v53 }
 0x2d4   :  { %962 = vst.msk [vmem:[%s1722_s6] sm:$0xf] %vm961_vm1, %v957_v50 }
 0x306   :  { %v965_v18 = vpop.permute.xlu0 %964 }
 0x307   :  { %968 = vst.msk [vmem:[%s1722_s6] sm:$0xf] %vm967_vm2, %v965_v18 }
 0x308   :  { %973 = vsyncpa [#allocation3], 1 }

</bundles_post_ra>
